<compile_context>
chip_gen: v7x
topology: tpu7x:2x2x1
jax: 0.10.0
libtpu: 0.0.40
codegen_flags: <defaults>
</compile_context>

<pallas_src>
import functools
import math

import jax
import jax.numpy as jnp
from jax import lax
from jax.experimental import pallas as pl
from jax.experimental.pallas import tpu as pltpu

_BF16 = jnp.bfloat16


# ----------------------------------------------------------------------------
# Kernel
# ----------------------------------------------------------------------------
def decoder_rnn_kernel(x_ref,        # (S*Bp, D)   f32, wavefront-step-major
                       win_ref,      # (D, 12H)    bf16  (x -> layer0 gates)
                       wbig_ref,     # (3H, 12H)   bf16  ([h0|h1|h2] -> gates)
                       bias_ref,     # (1, 12H)    f32
                       fc1w_ref,     # (H, FCp)    bf16
                       fc1b_ref,     # (1, FCp)    f32
                       fc2w_ref,     # (FCp, Cp)   bf16
                       fc2b_ref,     # (1, Cp)     f32
                       out_ref,      # (Bp, Cp)    f32   (lane-dense)
                       pre_ref):     # (S*Bp, 12H) f32   VMEM scratch
    H3 = wbig_ref.shape[0]           # 3H
    H = H3 // 3
    Bp = out_ref.shape[0]
    S = x_ref.shape[0] // Bp         # T + 2 wavefront steps

    # ---- hoisted: input projection + biases for ALL wavefront steps ---------
    # One MXU matmul (M = S*Bp) instead of S small ones; result staged in VMEM.
    pre_ref[...] = (jnp.dot(x_ref[...].astype(_BF16), win_ref[...],
                            preferred_element_type=jnp.float32)
                    + bias_ref[...])

    wbig = wbig_ref[...]             # loaded once; ~18 vregs of bf16

    # Warm-up lane masks (trace-time constants, used only at s = 0 and s = 1).
    lane = lax.broadcasted_iota(jnp.int32, (1, H3), 1)
    mask0 = (lane < H).astype(jnp.float32)        # keep only layer 0
    mask1 = (lane < 2 * H).astype(jnp.float32)    # keep layers 0 and 1

    hs = jnp.zeros((Bp, H3), jnp.float32)         # [h0 | h1 | h2]
    cs = jnp.zeros((Bp, H3), jnp.float32)         # [c0 | c1 | c2]

    # ---- wavefront recurrence, fully unrolled at trace time -----------------
    for s in range(S):
        # All three cells' gate pre-activations in one matmul; the pre slab
        # already contains x_t @ W_ih0 (layer 0) plus every layer's bias.
        g = pre_ref[s * Bp:(s + 1) * Bp, :] + jnp.dot(
            hs.astype(_BF16), wbig, preferred_element_type=jnp.float32)

        # Single full-width sigmoid; g-gate columns were pre-scaled by 2 so
        # tanh(z) = 2*sigmoid(2z) - 1 (one EUP stream instead of two).
        sg = jax.nn.sigmoid(g)                    # (Bp, 12H)
        i_g = sg[:, 0:H3]
        f_g = sg[:, H3:2 * H3]
        g_g = 2.0 * sg[:, 2 * H3:3 * H3] - 1.0
        o_g = sg[:, 3 * H3:4 * H3]

        # Full-width VPU state update, already in the [l0|l1|l2] lane layout.
        cs = f_g * cs + i_g * g_g
        hs = o_g * jnp.tanh(cs)

        # Warm-up: layers 1/2 must stay exactly zero until their first real t.
        if s == 0:
            hs = hs * mask0
            cs = cs * mask0
        elif s == 1:
            hs = hs * mask1
            cs = cs * mask1

    # ---- head: fc1 -> relu -> dropout(eval=identity) -> fc2 -----------------
    h_top = hs[:, 2 * H:3 * H]                    # layer-2 hidden at t = T-1
    y = jnp.dot(h_top.astype(_BF16), fc1w_ref[...],
                preferred_element_type=jnp.float32) + fc1b_ref[...]
    y = jnp.maximum(y, 0.0)
    # TODO(synk): F.dropout is treated as eval-mode identity (no in-kernel RNG).
    logits = jnp.dot(y.astype(_BF16), fc2w_ref[...],
                     preferred_element_type=jnp.float32) + fc2b_ref[...]
    out_ref[...] = logits.astype(out_ref.dtype)


# ----------------------------------------------------------------------------
# Parameter preparation (done once, outside the kernel)
# ----------------------------------------------------------------------------
def _round_up(x, m):
    return ((x + m - 1) // m) * m


def _scatter_gates(w, layer, H):
    """w: (K, 4H) in PyTorch gate order [i, f, g, o]  ->  (K, 12H) laid out
    gate-major / layer-minor: [i0 i1 i2 | f0 f1 f2 | g0 g1 g2 | o0 o1 o2].
    The g block is pre-scaled by 2 so the kernel can recover tanh(z) from a
    single full-width sigmoid as 2*sigmoid(2z) - 1 (exact scaling in bf16)."""
    K = w.shape[0]
    out = jnp.zeros((K, 12 * H), jnp.float32)
    for gi in range(4):
        blk = w[:, gi * H:(gi + 1) * H]
        if gi == 2:
            blk = blk * 2.0
        lo = gi * 3 * H + layer * H
        out = out.at[:, lo:lo + H].set(blk)
    return out


def prepare_params(p):
    H = p["whh0"].shape[0]
    FC = p["fc1w"].shape[1]
    C = p["fc2w"].shape[1]
    FCp = _round_up(FC, 128)
    Cp = _round_up(C, 128)

    # x feeds only layer-0 gates.
    w_in_big = _scatter_gates(p["wih0"], 0, H)                      # (D, 12H)

    # Row blocks of the recurrent matrix correspond to [h0 ; h1 ; h2]:
    #   h0 -> layer-0 recurrence and layer-1 input,
    #   h1 -> layer-1 recurrence and layer-2 input,
    #   h2 -> layer-2 recurrence.  (W_ih / W_hh stay un-fused along K.)
    w_big = jnp.concatenate([
        _scatter_gates(p["whh0"], 0, H) + _scatter_gates(p["wih1"], 1, H),
        _scatter_gates(p["whh1"], 1, H) + _scatter_gates(p["wih2"], 2, H),
        _scatter_gates(p["whh2"], 2, H),
    ], axis=0)                                                      # (3H, 12H)

    bias_big = (_scatter_gates(p["b0"], 0, H)
                + _scatter_gates(p["b1"], 1, H)
                + _scatter_gates(p["b2"], 2, H))                    # (1, 12H) f32

    # Lane-dense head: pad fc1/fc2 to 128-lane multiples (zero padding).
    fc1w = jnp.zeros((H, FCp), jnp.float32).at[:, :FC].set(p["fc1w"])
    fc1b = jnp.zeros((1, FCp), jnp.float32).at[:, :FC].set(p["fc1b"])
    fc2w = jnp.zeros((FCp, Cp), jnp.float32).at[:FC, :C].set(p["fc2w"])
    fc2b = jnp.zeros((1, Cp), jnp.float32).at[:, :C].set(p["fc2b"])

    return dict(
        w_in_big=w_in_big.astype(_BF16),
        w_big=w_big.astype(_BF16),
        bias_big=bias_big,
        fc1w=fc1w.astype(_BF16), fc1b=fc1b,
        fc2w=fc2w.astype(_BF16), fc2b=fc2b,
    )


# ----------------------------------------------------------------------------
# Wrapper (layout prep kept under the same jit as the pallas_call)
# ----------------------------------------------------------------------------
@functools.partial(jax.jit, static_argnames=("num_classes",))
def decoder_rnn_forward(x, prep, num_classes):
    """x: (B, T, D) float32 (batch_first, like the PyTorch module)."""
    B, T, D = x.shape
    H3, G12 = prep["w_big"].shape
    Cp = prep["fc2w"].shape[1]
    Bp = pl.cdiv(B, 8) * 8                 # pad batch to sublane width
    S = T + 2                              # wavefront steps

    # Wavefront-step-major slab: (S, Bp, D) with 2 trailing zero steps.
    x_tm = jnp.transpose(x, (1, 0, 2))                       # (T, B, D)
    x_tm = jnp.pad(x_tm, ((0, 2), (0, Bp - B), (0, 0)))      # (S, Bp, D)
    x_flat = x_tm.reshape(S * Bp, D)

    vmem = pl.BlockSpec(memory_space=pltpu.MemorySpace.VMEM)
    args = (x_flat, prep["w_in_big"], prep["w_big"], prep["bias_big"],
            prep["fc1w"], prep["fc1b"], prep["fc2w"], prep["fc2b"])

    # Everything is tiny (<0.3 MiB), so it stays fully VMEM-resident, gridless.
    out = pl.pallas_call(
        decoder_rnn_kernel,
        out_shape=jax.ShapeDtypeStruct((Bp, Cp), jnp.float32),
        in_specs=[vmem] * len(args),
        out_specs=vmem,
        scratch_shapes=[pltpu.VMEM((S * Bp, G12), jnp.float32)],
    )(*args)
    return out[:B, :num_classes]


# ----------------------------------------------------------------------------
# Pure-JAX reference (plain per-timestep LSTM, standard gate math)
# ----------------------------------------------------------------------------
def decoder_rnn_reference(x, p):
    B, T, D = x.shape
    H = p["whh0"].shape[0]

    def cell(xt, h, c, wih, whh, b):
        g = (jnp.dot(xt.astype(_BF16), wih.astype(_BF16),
                     preferred_element_type=jnp.float32)
             + jnp.dot(h.astype(_BF16), whh.astype(_BF16),
                       preferred_element_type=jnp.float32) + b)
        i = jax.nn.sigmoid(g[:, 0:H])
        f = jax.nn.sigmoid(g[:, H:2 * H])
        gg = jnp.tanh(g[:, 2 * H:3 * H])
        o = jax.nn.sigmoid(g[:, 3 * H:4 * H])
        c = f * c + i * gg
        h = o * jnp.tanh(c)
        return h, c

    zeros = jnp.zeros((B, H), jnp.float32)

    def step(carry, xt):
        h0, c0, h1, c1, h2, c2 = carry
        h0, c0 = cell(xt, h0, c0, p["wih0"], p["whh0"], p["b0"])
        h1, c1 = cell(h0, h1, c1, p["wih1"], p["whh1"], p["b1"])
        h2, c2 = cell(h1, h2, c2, p["wih2"], p["whh2"], p["b2"])
        return (h0, c0, h1, c1, h2, c2), None

    carry, _ = lax.scan(step, (zeros,) * 6, jnp.transpose(x, (1, 0, 2)))
    h_top = carry[4]
    y = jnp.maximum(jnp.dot(h_top.astype(_BF16), p["fc1w"].astype(_BF16),
                            preferred_element_type=jnp.float32) + p["fc1b"], 0.0)
    return (jnp.dot(y.astype(_BF16), p["fc2w"].astype(_BF16),
                    preferred_element_type=jnp.float32) + p["fc2b"])


# ----------------------------------------------------------------------------
# Parameter construction (PyTorch-style init, weights pre-transposed)
# ----------------------------------------------------------------------------
def make_params(key, D, H, FC, C):
    ks = jax.random.split(key, 16)

    def u(k, shape, bound):
        return jax.random.uniform(k, shape, jnp.float32, -bound, bound)

    kH = 1.0 / math.sqrt(H)
    kFC = 1.0 / math.sqrt(FC)
    # Weights pre-transposed to (in_dim, 4H), gate order [i, f, g, o];
    # b = b_ih + b_hh pre-summed.
    return dict(
        wih0=u(ks[0], (D, 4 * H), kH), whh0=u(ks[1], (H, 4 * H), kH),
        b0=u(ks[2], (1, 4 * H), kH) + u(ks[3], (1, 4 * H), kH),
        wih1=u(ks[4], (H, 4 * H), kH), whh1=u(ks[5], (H, 4 * H), kH),
        b1=u(ks[6], (1, 4 * H), kH) + u(ks[7], (1, 4 * H), kH),
        wih2=u(ks[8], (H, 4 * H), kH), whh2=u(ks[9], (H, 4 * H), kH),
        b2=u(ks[10], (1, 4 * H), kH) + u(ks[11], (1, 4 * H), kH),
        fc1w=u(ks[12], (H, FC), kH), fc1b=u(ks[13], (1, FC), kH),
        fc2w=u(ks[14], (FC, C), kFC), fc2b=u(ks[15], (1, C), kFC),
    )


if __name__ == "__main__":
    # Small shapes consistent with the module: CNN_embed_dim=32, h_RNN=32,
    # h_FC_dim=32, num_classes=16, 3 LSTM layers, batch=2, seq=8.
    B, T, D, H, FC, C = 2, 8, 32, 32, 32, 16

    root = jax.random.PRNGKey(0)
    k_params, k_x = jax.random.split(root)
    params = make_params(k_params, D, H, FC, C)
    prep = prepare_params(params)
    x = jax.random.normal(k_x, (B, T, D), jnp.float32)

    out = jax.block_until_ready(decoder_rnn_forward(x, prep, num_classes=C))
    ref = jax.block_until_ready(decoder_rnn_reference(x, params))

    assert out.shape == (B, C)
    assert jnp.allclose(out, ref, rtol=1e-2, atol=1e-2), "mismatch vs JAX reference"

    print("KERNEL_OK")
</pallas_src>

<mosaic_0001>
module attributes {stable_mosaic.version = 11 : i64} {
  func.func @decoder_rnn_kernel(%arg0: memref<80x32xf32, #tpu.memory_space<vmem>>, %arg1: memref<32x384xbf16, #tpu.memory_space<vmem>>, %arg2: memref<96x384xbf16, #tpu.memory_space<vmem>>, %arg3: memref<1x384xf32, #tpu.memory_space<vmem>>, %arg4: memref<32x128xbf16, #tpu.memory_space<vmem>>, %arg5: memref<1x128xf32, #tpu.memory_space<vmem>>, %arg6: memref<128x128xbf16, #tpu.memory_space<vmem>>, %arg7: memref<1x128xf32, #tpu.memory_space<vmem>>, %arg8: memref<8x128xf32, #tpu.memory_space<vmem>>, %arg9: memref<80x384xf32, #tpu.memory_space<vmem>>) attributes {dimension_semantics = [], scalar_prefetch = 0 : i64, scratch_operands = 1 : i64, tpu.core_type = #tpu.core_type<tc>} {
    %c0 = arith.constant 0 : index
    %c0_0 = arith.constant 0 : index
    %0 = vector.load %arg0[%c0, %c0_0] : memref<80x32xf32, #tpu.memory_space<vmem>>, vector<80x32xf32>
    %1 = arith.truncf %0 : vector<80x32xf32> to vector<80x32xbf16>
    %c0_1 = arith.constant 0 : index
    %c0_2 = arith.constant 0 : index
    %2 = vector.load %arg1[%c0_1, %c0_2] : memref<32x384xbf16, #tpu.memory_space<vmem>>, vector<32x384xbf16>
    %cst = arith.constant dense<0.000000e+00> : vector<80x384xf32>
    %3 = tpu.matmul %1, %2, %cst {dimension_numbers = #tpu.dot_dimension_numbers<[1], [0], [0], [1], [0, 0, 1, 1], [], []>} : vector<80x32xbf16>, vector<32x384xbf16>, vector<80x384xf32> -> vector<80x384xf32>
    %c0_3 = arith.constant 0 : index
    %c0_4 = arith.constant 0 : index
    %4 = vector.load %arg3[%c0_3, %c0_4] : memref<1x384xf32, #tpu.memory_space<vmem>>, vector<1x384xf32>
    %5 = vector.broadcast %4 : vector<1x384xf32> to vector<80x384xf32>
    %6 = arith.addf %3, %5 : vector<80x384xf32>
    %c0_5 = arith.constant 0 : index
    %c0_6 = arith.constant 0 : index
    %7 = vector.load %arg9[%c0_5, %c0_6] : memref<80x384xf32, #tpu.memory_space<vmem>>, vector<80x384xf32>
    tpu.vector_store %arg9[%c0_5, %c0_6], %6 {strides = array<i32>} : memref<80x384xf32, #tpu.memory_space<vmem>>, vector<80x384xf32>,
    %c0_7 = arith.constant 0 : index
    %c0_8 = arith.constant 0 : index
    %8 = vector.load %arg2[%c0_7, %c0_8] : memref<96x384xbf16, #tpu.memory_space<vmem>>, vector<96x384xbf16>
    %9 = tpu.iota {dimensions = array<i32: 1>} : vector<1x96xi32>
    %c32_i32 = arith.constant 32 : i32
    %10 = vector.broadcast %c32_i32 : i32 to vector<1x96xi32>
    %11 = arith.cmpi slt, %9, %10 : vector<1x96xi32>
    %12 = arith.extui %11 : vector<1x96xi1> to vector<1x96xi32>
    %13 = arith.sitofp %12 : vector<1x96xi32> to vector<1x96xf32>
    %c64_i32 = arith.constant 64 : i32
    %14 = vector.broadcast %c64_i32 : i32 to vector<1x96xi32>
    %15 = arith.cmpi slt, %9, %14 : vector<1x96xi32>
    %16 = arith.extui %15 : vector<1x96xi1> to vector<1x96xi32>
    %17 = arith.sitofp %16 : vector<1x96xi32> to vector<1x96xf32>
    %cst_9 = arith.constant 0.000000e+00 : f32
    %18 = vector.broadcast %cst_9 : f32 to vector<8x96xf32>
    %cst_10 = arith.constant 0.000000e+00 : f32
    %19 = vector.broadcast %cst_10 : f32 to vector<8x96xf32>
    %c0_11 = arith.constant 0 : index
    %c0_12 = arith.constant 0 : index
    %20 = vector.load %arg9[%c0_11, %c0_12] : memref<80x384xf32, #tpu.memory_space<vmem>>, vector<8x384xf32>
    %21 = arith.truncf %18 : vector<8x96xf32> to vector<8x96xbf16>
    %cst_13 = arith.constant dense<0.000000e+00> : vector<8x384xf32>
    %22 = tpu.matmul %21, %8, %cst_13 {dimension_numbers = #tpu.dot_dimension_numbers<[1], [0], [0], [1], [0, 0, 1, 1], [], []>} : vector<8x96xbf16>, vector<96x384xbf16>, vector<8x384xf32> -> vector<8x384xf32>
    %23 = arith.addf %20, %22 : vector<8x384xf32>
    %24 = arith.negf %23 : vector<8x384xf32>
    %25 = math.exp %24 : vector<8x384xf32>
    %cst_14 = arith.constant 1.000000e+00 : f32
    %26 = vector.broadcast %cst_14 : f32 to vector<8x384xf32>
    %27 = arith.addf %26, %25 : vector<8x384xf32>
    %28 = arith.divf %26, %27 : vector<8x384xf32>
    %29 = vector.extract_strided_slice %28 {offsets = [0, 0], sizes = [8, 96], strides = [1, 1]} : vector<8x384xf32> to vector<8x96xf32>
    %30 = vector.extract_strided_slice %28 {offsets = [0, 96], sizes = [8, 96], strides = [1, 1]} : vector<8x384xf32> to vector<8x96xf32>
    %31 = vector.extract_strided_slice %28 {offsets = [0, 192], sizes = [8, 96], strides = [1, 1]} : vector<8x384xf32> to vector<8x96xf32>
    %cst_15 = arith.constant 2.000000e+00 : f32
    %32 = vector.broadcast %cst_15 : f32 to vector<8x96xf32>
    %33 = arith.mulf %32, %31 : vector<8x96xf32>
    %cst_16 = arith.constant 1.000000e+00 : f32
    %34 = vector.broadcast %cst_16 : f32 to vector<8x96xf32>
    %35 = arith.subf %33, %34 : vector<8x96xf32>
    %36 = vector.extract_strided_slice %28 {offsets = [0, 288], sizes = [8, 96], strides = [1, 1]} : vector<8x384xf32> to vector<8x96xf32>
    %37 = arith.mulf %30, %19 : vector<8x96xf32>
    %38 = arith.mulf %29, %35 : vector<8x96xf32>
    %39 = arith.addf %37, %38 : vector<8x96xf32>
    %40 = math.tanh %39 : vector<8x96xf32>
    %41 = arith.mulf %36, %40 : vector<8x96xf32>
    %42 = vector.broadcast %13 : vector<1x96xf32> to vector<8x96xf32>
    %43 = arith.mulf %41, %42 : vector<8x96xf32>
    %44 = vector.broadcast %13 : vector<1x96xf32> to vector<8x96xf32>
    %45 = arith.mulf %39, %44 : vector<8x96xf32>
    %c8 = arith.constant 8 : index
    %c0_17 = arith.constant 0 : index
    %46 = vector.load %arg9[%c8, %c0_17] : memref<80x384xf32, #tpu.memory_space<vmem>>, vector<8x384xf32>
    %47 = arith.truncf %43 : vector<8x96xf32> to vector<8x96xbf16>
    %cst_18 = arith.constant dense<0.000000e+00> : vector<8x384xf32>
    %48 = tpu.matmul %47, %8, %cst_18 {dimension_numbers = #tpu.dot_dimension_numbers<[1], [0], [0], [1], [0, 0, 1, 1], [], []>} : vector<8x96xbf16>, vector<96x384xbf16>, vector<8x384xf32> -> vector<8x384xf32>
    %49 = arith.addf %46, %48 : vector<8x384xf32>
    %50 = arith.negf %49 : vector<8x384xf32>
    %51 = math.exp %50 : vector<8x384xf32>
    %cst_19 = arith.constant 1.000000e+00 : f32
    %52 = vector.broadcast %cst_19 : f32 to vector<8x384xf32>
    %53 = arith.addf %52, %51 : vector<8x384xf32>
    %54 = arith.divf %52, %53 : vector<8x384xf32>
    %55 = vector.extract_strided_slice %54 {offsets = [0, 0], sizes = [8, 96], strides = [1, 1]} : vector<8x384xf32> to vector<8x96xf32>
    %56 = vector.extract_strided_slice %54 {offsets = [0, 96], sizes = [8, 96], strides = [1, 1]} : vector<8x384xf32> to vector<8x96xf32>
    %57 = vector.extract_strided_slice %54 {offsets = [0, 192], sizes = [8, 96], strides = [1, 1]} : vector<8x384xf32> to vector<8x96xf32>
    %cst_20 = arith.constant 2.000000e+00 : f32
    %58 = vector.broadcast %cst_20 : f32 to vector<8x96xf32>
    %59 = arith.mulf %58, %57 : vector<8x96xf32>
    %cst_21 = arith.constant 1.000000e+00 : f32
    %60 = vector.broadcast %cst_21 : f32 to vector<8x96xf32>
    %61 = arith.subf %59, %60 : vector<8x96xf32>
    %62 = vector.extract_strided_slice %54 {offsets = [0, 288], sizes = [8, 96], strides = [1, 1]} : vector<8x384xf32> to vector<8x96xf32>
    %63 = arith.mulf %56, %45 : vector<8x96xf32>
    %64 = arith.mulf %55, %61 : vector<8x96xf32>
    %65 = arith.addf %63, %64 : vector<8x96xf32>
    %66 = math.tanh %65 : vector<8x96xf32>
    %67 = arith.mulf %62, %66 : vector<8x96xf32>
    %68 = vector.broadcast %17 : vector<1x96xf32> to vector<8x96xf32>
    %69 = arith.mulf %67, %68 : vector<8x96xf32>
    %70 = vector.broadcast %17 : vector<1x96xf32> to vector<8x96xf32>
    %71 = arith.mulf %65, %70 : vector<8x96xf32>
    %c16 = arith.constant 16 : index
    %c0_22 = arith.constant 0 : index
    %72 = vector.load %arg9[%c16, %c0_22] : memref<80x384xf32, #tpu.memory_space<vmem>>, vector<8x384xf32>
    %73 = arith.truncf %69 : vector<8x96xf32> to vector<8x96xbf16>
    %cst_23 = arith.constant dense<0.000000e+00> : vector<8x384xf32>
    %74 = tpu.matmul %73, %8, %cst_23 {dimension_numbers = #tpu.dot_dimension_numbers<[1], [0], [0], [1], [0, 0, 1, 1], [], []>} : vector<8x96xbf16>, vector<96x384xbf16>, vector<8x384xf32> -> vector<8x384xf32>
    %75 = arith.addf %72, %74 : vector<8x384xf32>
    %76 = arith.negf %75 : vector<8x384xf32>
    %77 = math.exp %76 : vector<8x384xf32>
    %cst_24 = arith.constant 1.000000e+00 : f32
    %78 = vector.broadcast %cst_24 : f32 to vector<8x384xf32>
    %79 = arith.addf %78, %77 : vector<8x384xf32>
    %80 = arith.divf %78, %79 : vector<8x384xf32>
    %81 = vector.extract_strided_slice %80 {offsets = [0, 0], sizes = [8, 96], strides = [1, 1]} : vector<8x384xf32> to vector<8x96xf32>
    %82 = vector.extract_strided_slice %80 {offsets = [0, 96], sizes = [8, 96], strides = [1, 1]} : vector<8x384xf32> to vector<8x96xf32>
    %83 = vector.extract_strided_slice %80 {offsets = [0, 192], sizes = [8, 96], strides = [1, 1]} : vector<8x384xf32> to vector<8x96xf32>
    %cst_25 = arith.constant 2.000000e+00 : f32
    %84 = vector.broadcast %cst_25 : f32 to vector<8x96xf32>
    %85 = arith.mulf %84, %83 : vector<8x96xf32>
    %cst_26 = arith.constant 1.000000e+00 : f32
    %86 = vector.broadcast %cst_26 : f32 to vector<8x96xf32>
    %87 = arith.subf %85, %86 : vector<8x96xf32>
    %88 = vector.extract_strided_slice %80 {offsets = [0, 288], sizes = [8, 96], strides = [1, 1]} : vector<8x384xf32> to vector<8x96xf32>
    %89 = arith.mulf %82, %71 : vector<8x96xf32>
    %90 = arith.mulf %81, %87 : vector<8x96xf32>
    %91 = arith.addf %89, %90 : vector<8x96xf32>
    %92 = math.tanh %91 : vector<8x96xf32>
    %93 = arith.mulf %88, %92 : vector<8x96xf32>
    %c24 = arith.constant 24 : index
    %c0_27 = arith.constant 0 : index
    %94 = vector.load %arg9[%c24, %c0_27] : memref<80x384xf32, #tpu.memory_space<vmem>>, vector<8x384xf32>
    %95 = arith.truncf %93 : vector<8x96xf32> to vector<8x96xbf16>
    %cst_28 = arith.constant dense<0.000000e+00> : vector<8x384xf32>
    %96 = tpu.matmul %95, %8, %cst_28 {dimension_numbers = #tpu.dot_dimension_numbers<[1], [0], [0], [1], [0, 0, 1, 1], [], []>} : vector<8x96xbf16>, vector<96x384xbf16>, vector<8x384xf32> -> vector<8x384xf32>
    %97 = arith.addf %94, %96 : vector<8x384xf32>
    %98 = arith.negf %97 : vector<8x384xf32>
    %99 = math.exp %98 : vector<8x384xf32>
    %cst_29 = arith.constant 1.000000e+00 : f32
    %100 = vector.broadcast %cst_29 : f32 to vector<8x384xf32>
    %101 = arith.addf %100, %99 : vector<8x384xf32>
    %102 = arith.divf %100, %101 : vector<8x384xf32>
    %103 = vector.extract_strided_slice %102 {offsets = [0, 0], sizes = [8, 96], strides = [1, 1]} : vector<8x384xf32> to vector<8x96xf32>
    %104 = vector.extract_strided_slice %102 {offsets = [0, 96], sizes = [8, 96], strides = [1, 1]} : vector<8x384xf32> to vector<8x96xf32>
    %105 = vector.extract_strided_slice %102 {offsets = [0, 192], sizes = [8, 96], strides = [1, 1]} : vector<8x384xf32> to vector<8x96xf32>
    %cst_30 = arith.constant 2.000000e+00 : f32
    %106 = vector.broadcast %cst_30 : f32 to vector<8x96xf32>
    %107 = arith.mulf %106, %105 : vector<8x96xf32>
    %cst_31 = arith.constant 1.000000e+00 : f32
    %108 = vector.broadcast %cst_31 : f32 to vector<8x96xf32>
    %109 = arith.subf %107, %108 : vector<8x96xf32>
    %110 = vector.extract_strided_slice %102 {offsets = [0, 288], sizes = [8, 96], strides = [1, 1]} : vector<8x384xf32> to vector<8x96xf32>
    %111 = arith.mulf %104, %91 : vector<8x96xf32>
    %112 = arith.mulf %103, %109 : vector<8x96xf32>
    %113 = arith.addf %111, %112 : vector<8x96xf32>
    %114 = math.tanh %113 : vector<8x96xf32>
    %115 = arith.mulf %110, %114 : vector<8x96xf32>
    %c32 = arith.constant 32 : index
    %c0_32 = arith.constant 0 : index
    %116 = vector.load %arg9[%c32, %c0_32] : memref<80x384xf32, #tpu.memory_space<vmem>>, vector<8x384xf32>
    %117 = arith.truncf %115 : vector<8x96xf32> to vector<8x96xbf16>
    %cst_33 = arith.constant dense<0.000000e+00> : vector<8x384xf32>
    %118 = tpu.matmul %117, %8, %cst_33 {dimension_numbers = #tpu.dot_dimension_numbers<[1], [0], [0], [1], [0, 0, 1, 1], [], []>} : vector<8x96xbf16>, vector<96x384xbf16>, vector<8x384xf32> -> vector<8x384xf32>
    %119 = arith.addf %116, %118 : vector<8x384xf32>
    %120 = arith.negf %119 : vector<8x384xf32>
    %121 = math.exp %120 : vector<8x384xf32>
    %cst_34 = arith.constant 1.000000e+00 : f32
    %122 = vector.broadcast %cst_34 : f32 to vector<8x384xf32>
    %123 = arith.addf %122, %121 : vector<8x384xf32>
    %124 = arith.divf %122, %123 : vector<8x384xf32>
    %125 = vector.extract_strided_slice %124 {offsets = [0, 0], sizes = [8, 96], strides = [1, 1]} : vector<8x384xf32> to vector<8x96xf32>
    %126 = vector.extract_strided_slice %124 {offsets = [0, 96], sizes = [8, 96], strides = [1, 1]} : vector<8x384xf32> to vector<8x96xf32>
    %127 = vector.extract_strided_slice %124 {offsets = [0, 192], sizes = [8, 96], strides = [1, 1]} : vector<8x384xf32> to vector<8x96xf32>
    %cst_35 = arith.constant 2.000000e+00 : f32
    %128 = vector.broadcast %cst_35 : f32 to vector<8x96xf32>
    %129 = arith.mulf %128, %127 : vector<8x96xf32>
    %cst_36 = arith.constant 1.000000e+00 : f32
    %130 = vector.broadcast %cst_36 : f32 to vector<8x96xf32>
    %131 = arith.subf %129, %130 : vector<8x96xf32>
    %132 = vector.extract_strided_slice %124 {offsets = [0, 288], sizes = [8, 96], strides = [1, 1]} : vector<8x384xf32> to vector<8x96xf32>
    %133 = arith.mulf %126, %113 : vector<8x96xf32>
    %134 = arith.mulf %125, %131 : vector<8x96xf32>
    %135 = arith.addf %133, %134 : vector<8x96xf32>
    %136 = math.tanh %135 : vector<8x96xf32>
    %137 = arith.mulf %132, %136 : vector<8x96xf32>
    %c40 = arith.constant 40 : index
    %c0_37 = arith.constant 0 : index
    %138 = vector.load %arg9[%c40, %c0_37] : memref<80x384xf32, #tpu.memory_space<vmem>>, vector<8x384xf32>
    %139 = arith.truncf %137 : vector<8x96xf32> to vector<8x96xbf16>
    %cst_38 = arith.constant dense<0.000000e+00> : vector<8x384xf32>
    %140 = tpu.matmul %139, %8, %cst_38 {dimension_numbers = #tpu.dot_dimension_numbers<[1], [0], [0], [1], [0, 0, 1, 1], [], []>} : vector<8x96xbf16>, vector<96x384xbf16>, vector<8x384xf32> -> vector<8x384xf32>
    %141 = arith.addf %138, %140 : vector<8x384xf32>
    %142 = arith.negf %141 : vector<8x384xf32>
    %143 = math.exp %142 : vector<8x384xf32>
    %cst_39 = arith.constant 1.000000e+00 : f32
    %144 = vector.broadcast %cst_39 : f32 to vector<8x384xf32>
    %145 = arith.addf %144, %143 : vector<8x384xf32>
    %146 = arith.divf %144, %145 : vector<8x384xf32>
    %147 = vector.extract_strided_slice %146 {offsets = [0, 0], sizes = [8, 96], strides = [1, 1]} : vector<8x384xf32> to vector<8x96xf32>
    %148 = vector.extract_strided_slice %146 {offsets = [0, 96], sizes = [8, 96], strides = [1, 1]} : vector<8x384xf32> to vector<8x96xf32>
    %149 = vector.extract_strided_slice %146 {offsets = [0, 192], sizes = [8, 96], strides = [1, 1]} : vector<8x384xf32> to vector<8x96xf32>
    %cst_40 = arith.constant 2.000000e+00 : f32
    %150 = vector.broadcast %cst_40 : f32 to vector<8x96xf32>
    %151 = arith.mulf %150, %149 : vector<8x96xf32>
    %cst_41 = arith.constant 1.000000e+00 : f32
    %152 = vector.broadcast %cst_41 : f32 to vector<8x96xf32>
    %153 = arith.subf %151, %152 : vector<8x96xf32>
    %154 = vector.extract_strided_slice %146 {offsets = [0, 288], sizes = [8, 96], strides = [1, 1]} : vector<8x384xf32> to vector<8x96xf32>
    %155 = arith.mulf %148, %135 : vector<8x96xf32>
    %156 = arith.mulf %147, %153 : vector<8x96xf32>
    %157 = arith.addf %155, %156 : vector<8x96xf32>
    %158 = math.tanh %157 : vector<8x96xf32>
    %159 = arith.mulf %154, %158 : vector<8x96xf32>
    %c48 = arith.constant 48 : index
    %c0_42 = arith.constant 0 : index
    %160 = vector.load %arg9[%c48, %c0_42] : memref<80x384xf32, #tpu.memory_space<vmem>>, vector<8x384xf32>
    %161 = arith.truncf %159 : vector<8x96xf32> to vector<8x96xbf16>
    %cst_43 = arith.constant dense<0.000000e+00> : vector<8x384xf32>
    %162 = tpu.matmul %161, %8, %cst_43 {dimension_numbers = #tpu.dot_dimension_numbers<[1], [0], [0], [1], [0, 0, 1, 1], [], []>} : vector<8x96xbf16>, vector<96x384xbf16>, vector<8x384xf32> -> vector<8x384xf32>
    %163 = arith.addf %160, %162 : vector<8x384xf32>
    %164 = arith.negf %163 : vector<8x384xf32>
    %165 = math.exp %164 : vector<8x384xf32>
    %cst_44 = arith.constant 1.000000e+00 : f32
    %166 = vector.broadcast %cst_44 : f32 to vector<8x384xf32>
    %167 = arith.addf %166, %165 : vector<8x384xf32>
    %168 = arith.divf %166, %167 : vector<8x384xf32>
    %169 = vector.extract_strided_slice %168 {offsets = [0, 0], sizes = [8, 96], strides = [1, 1]} : vector<8x384xf32> to vector<8x96xf32>
    %170 = vector.extract_strided_slice %168 {offsets = [0, 96], sizes = [8, 96], strides = [1, 1]} : vector<8x384xf32> to vector<8x96xf32>
    %171 = vector.extract_strided_slice %168 {offsets = [0, 192], sizes = [8, 96], strides = [1, 1]} : vector<8x384xf32> to vector<8x96xf32>
    %cst_45 = arith.constant 2.000000e+00 : f32
    %172 = vector.broadcast %cst_45 : f32 to vector<8x96xf32>
    %173 = arith.mulf %172, %171 : vector<8x96xf32>
    %cst_46 = arith.constant 1.000000e+00 : f32
    %174 = vector.broadcast %cst_46 : f32 to vector<8x96xf32>
    %175 = arith.subf %173, %174 : vector<8x96xf32>
    %176 = vector.extract_strided_slice %168 {offsets = [0, 288], sizes = [8, 96], strides = [1, 1]} : vector<8x384xf32> to vector<8x96xf32>
    %177 = arith.mulf %170, %157 : vector<8x96xf32>
    %178 = arith.mulf %169, %175 : vector<8x96xf32>
    %179 = arith.addf %177, %178 : vector<8x96xf32>
    %180 = math.tanh %179 : vector<8x96xf32>
    %181 = arith.mulf %176, %180 : vector<8x96xf32>
    %c56 = arith.constant 56 : index
    %c0_47 = arith.constant 0 : index
    %182 = vector.load %arg9[%c56, %c0_47] : memref<80x384xf32, #tpu.memory_space<vmem>>, vector<8x384xf32>
    %183 = arith.truncf %181 : vector<8x96xf32> to vector<8x96xbf16>
    %cst_48 = arith.constant dense<0.000000e+00> : vector<8x384xf32>
    %184 = tpu.matmul %183, %8, %cst_48 {dimension_numbers = #tpu.dot_dimension_numbers<[1], [0], [0], [1], [0, 0, 1, 1], [], []>} : vector<8x96xbf16>, vector<96x384xbf16>, vector<8x384xf32> -> vector<8x384xf32>
    %185 = arith.addf %182, %184 : vector<8x384xf32>
    %186 = arith.negf %185 : vector<8x384xf32>
    %187 = math.exp %186 : vector<8x384xf32>
    %cst_49 = arith.constant 1.000000e+00 : f32
    %188 = vector.broadcast %cst_49 : f32 to vector<8x384xf32>
    %189 = arith.addf %188, %187 : vector<8x384xf32>
    %190 = arith.divf %188, %189 : vector<8x384xf32>
    %191 = vector.extract_strided_slice %190 {offsets = [0, 0], sizes = [8, 96], strides = [1, 1]} : vector<8x384xf32> to vector<8x96xf32>
    %192 = vector.extract_strided_slice %190 {offsets = [0, 96], sizes = [8, 96], strides = [1, 1]} : vector<8x384xf32> to vector<8x96xf32>
    %193 = vector.extract_strided_slice %190 {offsets = [0, 192], sizes = [8, 96], strides = [1, 1]} : vector<8x384xf32> to vector<8x96xf32>
    %cst_50 = arith.constant 2.000000e+00 : f32
    %194 = vector.broadcast %cst_50 : f32 to vector<8x96xf32>
    %195 = arith.mulf %194, %193 : vector<8x96xf32>
    %cst_51 = arith.constant 1.000000e+00 : f32
    %196 = vector.broadcast %cst_51 : f32 to vector<8x96xf32>
    %197 = arith.subf %195, %196 : vector<8x96xf32>
    %198 = vector.extract_strided_slice %190 {offsets = [0, 288], sizes = [8, 96], strides = [1, 1]} : vector<8x384xf32> to vector<8x96xf32>
    %199 = arith.mulf %192, %179 : vector<8x96xf32>
    %200 = arith.mulf %191, %197 : vector<8x96xf32>
    %201 = arith.addf %199, %200 : vector<8x96xf32>
    %202 = math.tanh %201 : vector<8x96xf32>
    %203 = arith.mulf %198, %202 : vector<8x96xf32>
    %c64 = arith.constant 64 : index
    %c0_52 = arith.constant 0 : index
    %204 = vector.load %arg9[%c64, %c0_52] : memref<80x384xf32, #tpu.memory_space<vmem>>, vector<8x384xf32>
    %205 = arith.truncf %203 : vector<8x96xf32> to vector<8x96xbf16>
    %cst_53 = arith.constant dense<0.000000e+00> : vector<8x384xf32>
    %206 = tpu.matmul %205, %8, %cst_53 {dimension_numbers = #tpu.dot_dimension_numbers<[1], [0], [0], [1], [0, 0, 1, 1], [], []>} : vector<8x96xbf16>, vector<96x384xbf16>, vector<8x384xf32> -> vector<8x384xf32>
    %207 = arith.addf %204, %206 : vector<8x384xf32>
    %208 = arith.negf %207 : vector<8x384xf32>
    %209 = math.exp %208 : vector<8x384xf32>
    %cst_54 = arith.constant 1.000000e+00 : f32
    %210 = vector.broadcast %cst_54 : f32 to vector<8x384xf32>
    %211 = arith.addf %210, %209 : vector<8x384xf32>
    %212 = arith.divf %210, %211 : vector<8x384xf32>
    %213 = vector.extract_strided_slice %212 {offsets = [0, 0], sizes = [8, 96], strides = [1, 1]} : vector<8x384xf32> to vector<8x96xf32>
    %214 = vector.extract_strided_slice %212 {offsets = [0, 96], sizes = [8, 96], strides = [1, 1]} : vector<8x384xf32> to vector<8x96xf32>
    %215 = vector.extract_strided_slice %212 {offsets = [0, 192], sizes = [8, 96], strides = [1, 1]} : vector<8x384xf32> to vector<8x96xf32>
    %cst_55 = arith.constant 2.000000e+00 : f32
    %216 = vector.broadcast %cst_55 : f32 to vector<8x96xf32>
    %217 = arith.mulf %216, %215 : vector<8x96xf32>
    %cst_56 = arith.constant 1.000000e+00 : f32
    %218 = vector.broadcast %cst_56 : f32 to vector<8x96xf32>
    %219 = arith.subf %217, %218 : vector<8x96xf32>
    %220 = vector.extract_strided_slice %212 {offsets = [0, 288], sizes = [8, 96], strides = [1, 1]} : vector<8x384xf32> to vector<8x96xf32>
    %221 = arith.mulf %214, %201 : vector<8x96xf32>
    %222 = arith.mulf %213, %219 : vector<8x96xf32>
    %223 = arith.addf %221, %222 : vector<8x96xf32>
    %224 = math.tanh %223 : vector<8x96xf32>
    %225 = arith.mulf %220, %224 : vector<8x96xf32>
    %c72 = arith.constant 72 : index
    %c0_57 = arith.constant 0 : index
    %226 = vector.load %arg9[%c72, %c0_57] : memref<80x384xf32, #tpu.memory_space<vmem>>, vector<8x384xf32>
    %227 = arith.truncf %225 : vector<8x96xf32> to vector<8x96xbf16>
    %cst_58 = arith.constant dense<0.000000e+00> : vector<8x384xf32>
    %228 = tpu.matmul %227, %8, %cst_58 {dimension_numbers = #tpu.dot_dimension_numbers<[1], [0], [0], [1], [0, 0, 1, 1], [], []>} : vector<8x96xbf16>, vector<96x384xbf16>, vector<8x384xf32> -> vector<8x384xf32>
    %229 = arith.addf %226, %228 : vector<8x384xf32>
    %230 = arith.negf %229 : vector<8x384xf32>
    %231 = math.exp %230 : vector<8x384xf32>
    %cst_59 = arith.constant 1.000000e+00 : f32
    %232 = vector.broadcast %cst_59 : f32 to vector<8x384xf32>
    %233 = arith.addf %232, %231 : vector<8x384xf32>
    %234 = arith.divf %232, %233 : vector<8x384xf32>
    %235 = vector.extract_strided_slice %234 {offsets = [0, 0], sizes = [8, 96], strides = [1, 1]} : vector<8x384xf32> to vector<8x96xf32>
    %236 = vector.extract_strided_slice %234 {offsets = [0, 96], sizes = [8, 96], strides = [1, 1]} : vector<8x384xf32> to vector<8x96xf32>
    %237 = vector.extract_strided_slice %234 {offsets = [0, 192], sizes = [8, 96], strides = [1, 1]} : vector<8x384xf32> to vector<8x96xf32>
    %cst_60 = arith.constant 2.000000e+00 : f32
    %238 = vector.broadcast %cst_60 : f32 to vector<8x96xf32>
    %239 = arith.mulf %238, %237 : vector<8x96xf32>
    %cst_61 = arith.constant 1.000000e+00 : f32
    %240 = vector.broadcast %cst_61 : f32 to vector<8x96xf32>
    %241 = arith.subf %239, %240 : vector<8x96xf32>
    %242 = vector.extract_strided_slice %234 {offsets = [0, 288], sizes = [8, 96], strides = [1, 1]} : vector<8x384xf32> to vector<8x96xf32>
    %243 = arith.mulf %236, %223 : vector<8x96xf32>
    %244 = arith.mulf %235, %241 : vector<8x96xf32>
    %245 = arith.addf %243, %244 : vector<8x96xf32>
    %246 = math.tanh %245 : vector<8x96xf32>
    %247 = arith.mulf %242, %246 : vector<8x96xf32>
    %248 = vector.extract_strided_slice %247 {offsets = [0, 64], sizes = [8, 32], strides = [1, 1]} : vector<8x96xf32> to vector<8x32xf32>
    %249 = arith.truncf %248 : vector<8x32xf32> to vector<8x32xbf16>
    %c0_62 = arith.constant 0 : index
    %c0_63 = arith.constant 0 : index
    %250 = vector.load %arg4[%c0_62, %c0_63] : memref<32x128xbf16, #tpu.memory_space<vmem>>, vector<32x128xbf16>
    %cst_64 = arith.constant dense<0.000000e+00> : vector<8x128xf32>
    %251 = tpu.matmul %249, %250, %cst_64 {dimension_numbers = #tpu.dot_dimension_numbers<[1], [0], [0], [1], [0, 0, 1, 1], [], []>} : vector<8x32xbf16>, vector<32x128xbf16>, vector<8x128xf32> -> vector<8x128xf32>
    %c0_65 = arith.constant 0 : index
    %c0_66 = arith.constant 0 : index
    %252 = vector.load %arg5[%c0_65, %c0_66] : memref<1x128xf32, #tpu.memory_space<vmem>>, vector<1x128xf32>
    %253 = vector.broadcast %252 : vector<1x128xf32> to vector<8x128xf32>
    %254 = arith.addf %251, %253 : vector<8x128xf32>
    %cst_67 = arith.constant 0.000000e+00 : f32
    %255 = vector.broadcast %cst_67 : f32 to vector<8x128xf32>
    %256 = arith.maximumf %254, %255 : vector<8x128xf32>
    %257 = arith.truncf %256 : vector<8x128xf32> to vector<8x128xbf16>
    %c0_68 = arith.constant 0 : index
    %c0_69 = arith.constant 0 : index
    %258 = vector.load %arg6[%c0_68, %c0_69] : memref<128x128xbf16, #tpu.memory_space<vmem>>, vector<128x128xbf16>
    %cst_70 = arith.constant dense<0.000000e+00> : vector<8x128xf32>
    %259 = tpu.matmul %257, %258, %cst_70 {dimension_numbers = #tpu.dot_dimension_numbers<[1], [0], [0], [1], [0, 0, 1, 1], [], []>} : vector<8x128xbf16>, vector<128x128xbf16>, vector<8x128xf32> -> vector<8x128xf32>
    %c0_71 = arith.constant 0 : index
    %c0_72 = arith.constant 0 : index
    %260 = vector.load %arg7[%c0_71, %c0_72] : memref<1x128xf32, #tpu.memory_space<vmem>>, vector<1x128xf32>
    %261 = vector.broadcast %260 : vector<1x128xf32> to vector<8x128xf32>
    %262 = arith.addf %259, %261 : vector<8x128xf32>
    %c0_73 = arith.constant 0 : index
    %c0_74 = arith.constant 0 : index
    %263 = vector.load %arg8[%c0_73, %c0_74] : memref<8x128xf32, #tpu.memory_space<vmem>>, vector<8x128xf32>
    tpu.vector_store %arg8[%c0_73, %c0_74], %262 {strides = array<i32>} : memref<8x128xf32, #tpu.memory_space<vmem>>, vector<8x128xf32>,
    return
  }
}

</mosaic_0001>

<bundles_post_ra>
// kernel: decoder_rnn_forward.1
= control target key start
LH: loop header
LB: loop body
LE: loop exit
PB: predicated region body
PF: predicated region fallthrough
CT: control target
= control target key end

     0   :  { %13 = vsyncpa [#allocation4], 0  ;;  %s3784_s0 = inlined_call_operand.vmem [shape: f32[80,32], index: 0, kind: input, shape index: {}]   ;;  %s3785_s1 = inlined_call_operand.hbm [shape: bf16[32,384], index: 1, kind: input, shape index: {}]   ;;  %s3786_s2 = inlined_call_operand.vmem [shape: bf16[96,384], index: 2, kind: input, shape index: {}]   ;;  %s3787_s3 = inlined_call_operand.vmem [shape: f32[1,384], index: 3, kind: input, shape index: {}]   ;;  %s3788_s4 = inlined_call_operand.hbm [shape: bf16[32,128], index: 4, kind: input, shape index: {}]   ;;  %s3789_s5 = inlined_call_operand.vmem [shape: f32[1,128], index: 5, kind: input, shape index: {}]   ;;  %s3790_s6 = inlined_call_operand.hbm [shape: bf16[128,128], index: 6, kind: input, shape index: {}]   ;;  %s3791_s7 = inlined_call_operand.vmem [shape: f32[1,128], index: 7, kind: input, shape index: {}]   ;;  %s3792_s8 = inlined_call_operand.vmem [shape: f32[8,128], index: 8, kind: output, shape index: {}]  }
   0x1   :  { %14 = vsyncpa [#allocation6], 0  ;;  %s2841_s27 = smov [#allocation5]   ;;  %s2771_s9 = scalar_lea.hbm %s3788_s4, 256 }
   0x2   :  { %s38_s28 = sshll.u32 %s2841_s27, 4  ;;  %p2772_p0 = scmp.ne.s32.totalorder %s3788_s4, %s2771_s9  ;;  %s39_s28 = int_to_ptr.vmem [resolvable:$true] %s38_s28 }
   0x3   :  { %p2775_p1 = scmp.lt.u32.totalorder %s2771_s9, %s3788_s4 }
   0x5   :  { %p2777_p2 = pnand %p2775_p1, %p2772_p0 }
   0x7   :  { %2780 = shalt.err (!%p2777_p2)
}
   0x8   :  { %s2781_s14 = scalar_lea.vmem %s39_s28, 256  ;;  %p2786_p4 = scmp.lt.s32.totalorder %s39_s28, %s39_s28 }
   0x9   :  { %p2782_p3 = scmp.ne.s32.totalorder %s39_s28, %s2781_s14  ;;  %p2787_p5 = scmp.lt.s32.totalorder %s2781_s14, %s2781_s14 }
   0xb   :  { %p2788_p6 = por %p2787_p5, %p2786_p4 }
   0xd   :  { %p2789_p7 = pnand %p2788_p6, %p2782_p3 }
   0xf   :  { %2792 = shalt.err (!%p2789_p7)
}
  0x10   :  { %s2842_s15 = smov 64   ;;  %s2843_s16 = smov 4  }
  0x11   :  { %44 = dma.hbm_to_vmem [thread:$0]  %s3788_s4, 256, %s39_s28, [#allocation6], %s2842_s15, %s2842_s15, %s2843_s16  }
  0x12   :  { %s2844_s19 = smov [#allocation3]   ;;  %s2793_s23 = scalar_lea.hbm %s3785_s1, 768 }
  0x13   :  { %s22_s20 = sshll.u32 %s2844_s19, 4  ;;  %p2794_p8 = scmp.ne.s32.totalorder %s3785_s1, %s2793_s23  ;;  %s23_s20 = int_to_ptr.vmem [resolvable:$true] %s22_s20 }
  0x14   :  { %p2797_p9 = scmp.lt.u32.totalorder %s2793_s23, %s3785_s1 }
  0x16   :  { %p2799_p10 = pnand %p2797_p9, %p2794_p8 }
  0x18   :  { %2802 = shalt.err (!%p2799_p10)
}
  0x19   :  { %s2803_s29 = scalar_lea.vmem %s23_s20, 768  ;;  %p2808_p12 = scmp.lt.s32.totalorder %s23_s20, %s23_s20 }
  0x1a   :  { %p2804_p11 = scmp.ne.s32.totalorder %s23_s20, %s2803_s29  ;;  %p2809_p13 = scmp.lt.s32.totalorder %s2803_s29, %s2803_s29 }
  0x1c   :  { %p2810_p0 = por %p2809_p13, %p2808_p12 }
  0x1e   :  { %p2811_p1 = pnand %p2810_p0, %p2804_p11 }
  0x20   :  { %2814 = shalt.err (!%p2811_p1)
}
  0x21   :  { %s2845_s4 = smov 192   ;;  %s2846_s28 = smov 12  }
  0x22   :  { %28 = dma.hbm_to_vmem [thread:$0]  %s3785_s1, 768, %s23_s20, [#allocation4], %s2845_s4, %s2845_s4, %s2846_s28  }
  0x23   :  { %s2847_s10 = smov [#allocation7]   ;;  %s2815_s14 = scalar_lea.hbm %s3790_s6, 1024 }
  0x24   :  { %s52_s11 = sshll.u32 %s2847_s10, 4  ;;  %p2816_p2 = scmp.ne.s32.totalorder %s3790_s6, %s2815_s14  ;;  %s53_s11 = int_to_ptr.vmem [resolvable:$true] %s52_s11 }
  0x25   :  { %p2819_p3 = scmp.lt.u32.totalorder %s2815_s14, %s3790_s6 }
  0x27   :  { %p2821_p4 = pnand %p2819_p3, %p2816_p2 }
  0x29   :  { %2824 = shalt.err (!%p2821_p4)
}
  0x2a   :  { %s2825_s22 = scalar_lea.vmem %s53_s11, 1024  ;;  %p2830_p6 = scmp.lt.s32.totalorder %s53_s11, %s53_s11 }
  0x2b   :  { %p2826_p5 = scmp.ne.s32.totalorder %s53_s11, %s2825_s22  ;;  %p2831_p7 = scmp.lt.s32.totalorder %s2825_s22, %s2825_s22 }
  0x2d   :  { %p2832_p8 = por %p2831_p7, %p2830_p6 }
  0x2f   :  { %p2833_p9 = pnand %p2832_p8, %p2826_p5 }
  0x31   :  { %2836 = shalt.err (!%p2833_p9)
}
  0x32   :  { %58 = dma.hbm_to_vmem [thread:$0]  %s3790_s6, 1024, %s53_s11, [#allocation6], %s2842_s15, %s2842_s15, %s2843_s16  }
  0x33   :  { %2837 = dma.done.wait [#allocation4], 768  }
  0x34   :  { %2838 = vsyncadd [#allocation4], 4294966528 }
  0x35   :  { %2839 = dma.done.wait [#allocation6], 1280  }
  0x36   :  { %2840 = vsyncadd [#allocation6], 4294966016  ;;  %v3795_v0 = vmov 0.0   ;;  %vm2849_vm0 = vmmov 0   ;;  %v3793_v1 = vmov 0   ;;  %v71_v8 = vld [vmem:[%s3784_s0] sm:$0xff]  ;;  %v3797_v41 = vlaneseq }
  0x37   :  { %2327 = vmatprep.subr.bf16.mxu1 %v3795_v0  ;;  %2331 = vmatprep.mubr.msk.bf16.mxu1 %vm2849_vm0, %v3795_v0  ;;  %v2551_v2 = vld [vmem:[#allocation3 + $0x4] ss:$12 sps:$4 sm:$0xff]   ;;  %v2553_v3 = vld [vmem:[#allocation3 + $0x8] ss:$12 sps:$4 sm:$0xff]   ;;  %v2554_v4 = vld [vmem:[#allocation3] ss:$12 sps:$4 sm:$0xff]  }
  0x38   :  { %191 = vmatprep.mubr.bf16.mxu0 %v3793_v1  ;;  %159 = vmatprep.subr.bf16.mxu0 %v2551_v2  ;;  %v2555_v5 = vld [vmem:[#allocation3 + $0x1c] ss:$12 sps:$4 sm:$0xff]   ;;  %v2557_v6 = vld [vmem:[#allocation3 + $0x20] ss:$12 sps:$4 sm:$0xff]   ;;  %v2558_v7 = vld [vmem:[#allocation3 + $0x18] ss:$12 sps:$4 sm:$0xff]  }
  0x39   :  { %2328 = vmatpush3.bf16.msra.mxu1 %v2553_v3  ;;  %160 = vmatpush1.bf16.msra.mxu0 %v2554_v4  ;;  %v72_v9 = vld [vmem:[%s3784_s0 + $0x8] sm:$0xff]  ;;  %v2954_v11 = vld [vmem:[%s3786_s2 + $0x4] ss:$12 sps:$4 sm:$0xff]   ;;  %vm143_vm1 = vcmask 261120   ;;  %v74_v16 = vld [vmem:[%s3784_s0 + $0x18] sm:$0xff]  ;;  %v97_v42 = vshrl.u32 %v3797_v41, 7 }
  0x3a   :  { %2329 = vmatprep.subr.bf16.mxu1 %v3795_v0  ;;  %161 = vmatprep.subr.bf16.mxu0 %v2555_v5  ;;  %v81_v10 = vpack.c.bf16 %v72_v9, %v71_v8  ;;  %v2959_v12 = vld [vmem:[%s3786_s2] ss:$12 sps:$4 sm:$0xff]   ;;  %v2965_v13 = vld [vmem:[%s3786_s2 + $0x8] ss:$12 sps:$4 sm:$0xff]   ;;  %v2988_v17 = vld [vmem:[%s3786_s2 + $0x18] ss:$12 sps:$4 sm:$0xff]  }
  0x3b   :  { %v2971_v14 = vld [vmem:[%s3786_s2 + $0x1c] ss:$12 sps:$4 sm:$0xff]   ;;  %v73_v15 = vld [vmem:[%s3784_s0 + $0x10] sm:$0xff]  ;;  %v2993_v18 = vld [vmem:[%s3786_s2 + $0x20] ss:$12 sps:$4 sm:$0xff]   ;;  %v106_v43 = vsub.s32 2, %v97_v42 }
  0x3c   :  { %v3000_v19 = vld [vmem:[%s3786_s2 + $0x34] ss:$12 sps:$4 sm:$0xff]   ;;  %v82_v20 = vpack.c.bf16 %v74_v16, %v73_v15  ;;  %v3008_v21 = vld [vmem:[%s3786_s2 + $0x30] ss:$12 sps:$4 sm:$0xff]   ;;  %v3015_v22 = vld [vmem:[%s3786_s2 + $0x4c] ss:$12 sps:$4 sm:$0xff]  }
  0x3d   :  { %2330 = vmatpush3.bf16.msra.mxu1 %v2557_v6  ;;  %162 = vmatpush1.bf16.msra.mxu0 %v2558_v7  ;;  %v3020_v23 = vld [vmem:[%s3786_s2 + $0x38] ss:$12 sps:$4 sm:$0xff]   ;;  %v76_v25 = vld [vmem:[%s3784_s0 + $0x28] sm:$0xff]  ;;  %v3042_v27 = vld [vmem:[%s3786_s2 + $0x50] ss:$12 sps:$4 sm:$0xff]   ;;  %v98_v45 = vsub.s32 0, %v97_v42 }
  0x3e   :  { %2351 = vmatprep.subr.bf16.mxu1 %v3795_v0  ;;  %480 = vmatprep.subr.bf16.mxu0 %v2954_v11  ;;  %v75_v24 = vld [vmem:[%s3784_s0 + $0x20] sm:$0xff]  ;;  %v3037_v26 = vld [vmem:[%s3786_s2 + $0x48] ss:$12 sps:$4 sm:$0xff]   ;;  %v78_v34 = vld [vmem:[%s3784_s0 + $0x38] sm:$0xff]  ;;  %v102_v46 = vsub.s32 1, %v97_v42  ;;  %vm594_vm2 = vcmask 523264  }
  0x3f   :  { %v3049_v28 = vld [vmem:[%s3786_s2 + $0x64] ss:$12 sps:$4 sm:$0xff]   ;;  %v83_v29 = vpack.c.bf16 %v76_v25, %v75_v24  ;;  %v3055_v30 = vld [vmem:[%s3786_s2 + $0x60] ss:$12 sps:$4 sm:$0xff]   ;;  %v3060_v31 = vld [vmem:[%s3786_s2 + $0x68] ss:$12 sps:$4 sm:$0xff]  }
  0x40   :  { %2332 = vmatmul.mubr.msk.bf16.vlgmr.msra.gmra.mrb[0].mxu1 %vm143_vm1, %v81_v10  ;;  %2127 = vmatmul.mubr.msk.bf16.vlgmr.msra.gmra.mrb[0].mxu0 %vm143_vm1, %v81_v10  ;;  %v3065_v32 = vld [vmem:[%s3786_s2 + $0x7c] ss:$12 sps:$4 sm:$0xff]   ;;  %v77_v33 = vld [vmem:[%s3784_s0 + $0x30] sm:$0xff]  ;;  %v3081_v35 = vld [vmem:[%s3786_s2 + $0x78] ss:$12 sps:$4 sm:$0xff]   ;;  %s2852_s28 = smov 32  }
  0x41   :  { %2335 = vmatprep.mubr.msk.bf16.mxu1 %vm2849_vm0, %v3795_v0  ;;  %481 = vmatpush1.bf16.msra.mxu0 %v2959_v12  ;;  %v3093_v36 = vld [vmem:[%s3786_s2 + $0x80] ss:$12 sps:$4 sm:$0xff]   ;;  %v84_v37 = vpack.c.bf16 %v78_v34, %v77_v33  ;;  %vm476_vm4 = vcmask 785408  }
  0x42   :  { %2352 = vmatpush3.bf16.msra.mxu1 %v2965_v13  ;;  %201 = vmatprep.mubr.bf16.mxu0 %v3793_v1  ;;  %v79_v38 = vld [vmem:[%s3784_s0 + $0x40] sm:$0xff]  ;;  %v80_v39 = vld [vmem:[%s3784_s0 + $0x48] sm:$0xff] }
  0x43   :  { %482 = vmatprep.subr.bf16.mxu0 %v2971_v14  ;;  %2353 = vmatprep.subr.bf16.mxu1 %v3795_v0  ;;  %v85_v40 = vpack.c.bf16 %v80_v39, %v79_v38  ;;  %v94_v44 = vld [vmem:[%s3787_s3] sm:$0x7]  ;;  %s2851_s3 = smov 96  }
  0x44   :  { %v3149_v47 = vrot.slane %v94_v44, %v106_v43  ;;  %v3155_v51 = vrot.slane %v94_v44, %v98_v45  ;;  %v3159_v54 = vrot.slane %v94_v44, %v102_v46 }
  0x45   :  { %483 = vmatpush1.bf16.msra.mxu0 %v2988_v17 }
  0x46   :  { %2354 = vmatpush3.bf16.msra.mxu1 %v2993_v18  ;;  %484 = vmatprep.subr.bf16.mxu0 %v3000_v19 }
  0x47   :  { %2355 = vmatprep.subr.bf16.mxu1 %v3795_v0 }
  0x48   :  { %2336 = vmatmul.mubr.msk.bf16.gmra.mrb[4].mxu1 %vm143_vm1, %v82_v20  ;;  %2128 = vmatmul.mubr.msk.bf16.gmra.mrb[4].mxu0 %vm143_vm1, %v82_v20 }
  0x49   :  { %2339 = vmatprep.mubr.msk.bf16.mxu1 %vm2849_vm0, %v3795_v0  ;;  %211 = vmatprep.mubr.bf16.mxu0 %v3793_v1 }
  0x4a   :  { %485 = vmatpush1.bf16.msra.mxu0 %v3008_v21  ;;  %2356 = vmatpush3.bf16.msra.mxu1 %v3020_v23 }
  0x4b   :  { %486 = vmatprep.subr.bf16.mxu0 %v3015_v22  ;;  %2357 = vmatprep.subr.bf16.mxu1 %v3795_v0 }
  0x4e   :  { %487 = vmatpush1.bf16.msra.mxu0 %v3037_v26  ;;  %2358 = vmatpush3.bf16.msra.mxu1 %v3042_v27 }
  0x4f   :  { %488 = vmatprep.subr.bf16.mxu0 %v3049_v28  ;;  %2359 = vmatprep.subr.bf16.mxu1 %v3795_v0 }
  0x50   :  { %2340 = vmatmul.mubr.msk.bf16.gmra.mrb[8].mxu1 %vm143_vm1, %v83_v29  ;;  %2129 = vmatmul.mubr.msk.bf16.gmra.mrb[8].mxu0 %vm143_vm1, %v83_v29 }
  0x51   :  { %2343 = vmatprep.mubr.msk.bf16.mxu1 %vm2849_vm0, %v3795_v0  ;;  %221 = vmatprep.mubr.bf16.mxu0 %v3793_v1 }
  0x52   :  { %489 = vmatpush1.bf16.msra.mxu0 %v3055_v30  ;;  %2360 = vmatpush3.bf16.msra.mxu1 %v3060_v31 }
  0x53   :  { %490 = vmatprep.subr.bf16.mxu0 %v3065_v32  ;;  %2361 = vmatprep.subr.bf16.mxu1 %v3795_v0 }
  0x56   :  { %491 = vmatpush1.bf16.msra.mxu0 %v3081_v35  ;;  %2362 = vmatpush3.bf16.msra.mxu1 %v3093_v36 }
  0x57   :  { %635 = vmatprep.subr.bf16.mxu0 %v2954_v11  ;;  %2367 = vmatprep.subr.bf16.mxu1 %v3795_v0 }
  0x58   :  { %2344 = vmatmul.mubr.msk.bf16.gmra.mrb[12].mxu1 %vm143_vm1, %v84_v37  ;;  %2130 = vmatmul.mubr.msk.bf16.gmra.mrb[12].mxu0 %vm143_vm1, %v84_v37 }
  0x59   :  { %2347 = vmatprep.mubr.msk.bf16.mxu1 %vm2849_vm0, %v3795_v0  ;;  %231 = vmatprep.mubr.bf16.mxu0 %v3793_v1 }
  0x60   :  { %2348 = vmatmul.mubr.msk.bf16.gmra.mrb[16].mxu1 %vm143_vm1, %v85_v40  ;;  %2131 = vmatmul.mubr.msk.bf16.gmra.mrb[16].mxu0 %vm143_vm1, %v85_v40 }
  0x61   :  { %2363 = vmatprep.mubr.msk.bf16.mxu1 %vm2849_vm0, %v3795_v0  ;;  %512 = vmatprep.mubr.bf16.mxu0 %v3793_v1 }
  0x68   :  { %2364 = vmatmul.mubr.bf16.vlgmr.msra.gmra.mrb[20].mxu1 %v3793_v1  ;;  %513 = vmatmul.mubr.bf16.vlgmr.msra.gmra.mrb[20].mxu0 %v3793_v1 }
  0x69   :  { %2368 = vmatpush3.bf16.msra.mxu1 %v2965_v13  ;;  %636 = vmatpush1.bf16.msra.mxu0 %v2959_v12 }
  0x6a   :  { %2369 = vmatprep.subr.bf16.mxu1 %v3795_v0  ;;  %637 = vmatprep.subr.bf16.mxu0 %v2971_v14 }
  0x6b   :  { %667 = vmatprep.mubr.bf16.mxu0 %v3793_v1  ;;  %2379 = vmatprep.mubr.msk.bf16.mxu1 %vm2849_vm0, %v3795_v0 }
  0x6d   :  { %2370 = vmatpush3.bf16.msra.mxu1 %v2993_v18  ;;  %638 = vmatpush1.bf16.msra.mxu0 %v2988_v17 }
  0x6e   :  { %2371 = vmatprep.subr.bf16.mxu1 %v3795_v0  ;;  %639 = vmatprep.subr.bf16.mxu0 %v3000_v19 }
  0x71   :  { %2372 = vmatpush3.bf16.msra.mxu1 %v3020_v23  ;;  %640 = vmatpush1.bf16.msra.mxu0 %v3008_v21 }
  0x72   :  { %2373 = vmatprep.subr.bf16.mxu1 %v3795_v0  ;;  %641 = vmatprep.subr.bf16.mxu0 %v3015_v22 }
  0x75   :  { %2374 = vmatpush3.bf16.msra.mxu1 %v3042_v27  ;;  %642 = vmatpush1.bf16.msra.mxu0 %v3037_v26 }
  0x76   :  { %2375 = vmatprep.subr.bf16.mxu1 %v3795_v0  ;;  %643 = vmatprep.subr.bf16.mxu0 %v3049_v28 }
  0x79   :  { %2376 = vmatpush3.bf16.msra.mxu1 %v3060_v31  ;;  %644 = vmatpush1.bf16.msra.mxu0 %v3055_v30 }
  0x7a   :  { %2377 = vmatprep.subr.bf16.mxu1 %v3795_v0  ;;  %645 = vmatprep.subr.bf16.mxu0 %v3065_v32 }
  0x7d   :  { %2378 = vmatpush3.bf16.msra.mxu1 %v3093_v36  ;;  %646 = vmatpush1.bf16.msra.mxu0 %v3081_v35 }
  0x7e   :  { %2383 = vmatprep.subr.bf16.mxu1 %v3795_v0  ;;  %789 = vmatprep.subr.bf16.mxu0 %v2954_v11 }
 0x113   :  { %v3151_v48 = vpop.f32.mrb[0].mxu1  ;;  %v3153_v49 = vpop.f32.mrb[0].mxu0 }
 0x114   :  { %v2333_v50 = vpop.f32.mrb[1].mxu1  ;;  %v3157_v52 = vpop.f32.mrb[1].mxu0 }
 0x115   :  { %v279_v53 = vpop.f32.mrb[2].mxu1  ;;  %v197_v55 = vpop.f32.mrb[2].mxu0 }
 0x116   :  { %v3162_v56 = vadd.f32 %v279_v53, %v3149_v47  ;;  %v2334_v57 = vpop.f32.mrb[3].mxu1  ;;  %v3165_v58 = vadd.f32 %v197_v55, %v3155_v51  ;;  %v199_v59 = vpop.f32.mrb[3].mxu0 }
 0x117   :  { %v3168_v60 = vadd.f32 %v199_v59, %v3159_v54 }
 0x11b   :  { %v284_v61 = vpop.f32.mrb[4].mxu1  ;;  %v203_v62 = vpop.f32.mrb[4].mxu0 }
 0x11c   :  { %v3171_v63 = vadd.f32 %v284_v61, %v3149_v47  ;;  %v2337_v2 = vpop.f32.mrb[5].mxu1  ;;  %v3174_v3 = vadd.f32 %v203_v62, %v3155_v51  ;;  %v205_v4 = vpop.f32.mrb[5].mxu0 }
 0x11d   :  { %v287_v5 = vpop.f32.mrb[6].mxu1  ;;  %v3177_v6 = vadd.f32 %v205_v4, %v3159_v54  ;;  %v207_v7 = vpop.f32.mrb[6].mxu0 }
 0x11e   :  { %v3180_v8 = vadd.f32 %v287_v5, %v3149_v47  ;;  %v2338_v9 = vpop.f32.mrb[7].mxu1  ;;  %v3183_v10 = vadd.f32 %v207_v7, %v3155_v51  ;;  %v209_v15 = vpop.f32.mrb[7].mxu0 }
 0x11f   :  { %v3186_v16 = vadd.f32 %v209_v15, %v3159_v54 }
 0x123   :  { %v292_v20 = vpop.f32.mrb[8].mxu1  ;;  %v213_v24 = vpop.f32.mrb[8].mxu0 }
 0x124   :  { %v3189_v25 = vadd.f32 %v292_v20, %v3149_v47  ;;  %v2341_v29 = vpop.f32.mrb[9].mxu1  ;;  %v3192_v33 = vadd.f32 %v213_v24, %v3155_v51  ;;  %v215_v34 = vpop.f32.mrb[9].mxu0 }
 0x125   :  { %v295_v37 = vpop.f32.mrb[10].mxu1  ;;  %v3195_v38 = vadd.f32 %v215_v34, %v3159_v54  ;;  %v217_v39 = vpop.f32.mrb[10].mxu0 }
 0x126   :  { %v3198_v40 = vadd.f32 %v295_v37, %v3149_v47  ;;  %v2342_v42 = vpop.f32.mrb[11].mxu1  ;;  %v3201_v43 = vadd.f32 %v217_v39, %v3155_v51  ;;  %v219_v44 = vpop.f32.mrb[11].mxu0 }
 0x127   :  { %v3204_v45 = vadd.f32 %v219_v44, %v3159_v54 }
 0x12b   :  { %v300_v46 = vpop.f32.mrb[12].mxu1  ;;  %v223_v50 = vpop.f32.mrb[12].mxu0 }
 0x12c   :  { %v3207_v53 = vadd.f32 %v300_v46, %v3149_v47  ;;  %v2345_v55 = vpop.f32.mrb[13].mxu1  ;;  %v3210_v57 = vadd.f32 %v223_v50, %v3155_v51  ;;  %v225_v59 = vpop.f32.mrb[13].mxu0 }
 0x12d   :  { %v303_v61 = vpop.f32.mrb[14].mxu1  ;;  %v3213_v62 = vadd.f32 %v225_v59, %v3159_v54  ;;  %v227_v2 = vpop.f32.mrb[14].mxu0 }
 0x12e   :  { %v3216_v4 = vadd.f32 %v303_v61, %v3149_v47  ;;  %v2346_v5 = vpop.f32.mrb[15].mxu1  ;;  %v3219_v7 = vadd.f32 %v227_v2, %v3155_v51  ;;  %v229_v9 = vpop.f32.mrb[15].mxu0 }
 0x12f   :  { %v3222_v15 = vadd.f32 %v229_v9, %v3159_v54  ;;  %v277_v5 = vadd.f32 %v3151_v48, %v3149_v47  ;;  %v194_v9 = vadd.f32 %v3153_v49, %v3155_v51 }
 0x133   :  { %v308_v20 = vpop.f32.mrb[16].mxu1  ;;  %v233_v24 = vpop.f32.mrb[16].mxu0 }
 0x134   :  { %v3225_v29 = vadd.f32 %v308_v20, %v3149_v47  ;;  %v2349_v34 = vpop.f32.mrb[17].mxu1  ;;  %v3228_v37 = vadd.f32 %v233_v24, %v3155_v51  ;;  %v235_v39 = vpop.f32.mrb[17].mxu0  ;;  %v196_v24 = vadd.f32 %v3157_v52, %v3159_v54 }
 0x135   :  { %v311_v42 = vpop.f32.mrb[18].mxu1  ;;  %v3231_v44 = vadd.f32 %v235_v39, %v3159_v54  ;;  %v237_v46 = vpop.f32.mrb[18].mxu0 }
 0x136   :  { %v3234_v50 = vadd.f32 %v311_v42, %v3149_v47  ;;  %v2350_v55 = vpop.f32.mrb[19].mxu1  ;;  %v3237_v59 = vadd.f32 %v237_v46, %v3155_v51  ;;  %v239_v61 = vpop.f32.mrb[19].mxu0 }
 0x137   :  { %3798 = vst [vmem:[#allocation10_spill] sm:$0xff] %v3231_v44  ;;  %v3240_v2 = vadd.f32 %v239_v61, %v3159_v54 }
 0x138   :  { %3799 = vst [vmem:[#allocation11_spill] sm:$0xff] %v3234_v50  ;;  %3800 = vst [vmem:[#allocation12_spill] sm:$0xff] %v3237_v59 }
 0x139   :  { %3801 = vst [vmem:[#allocation13_spill] sm:$0xff] %v3240_v2 }
 0x13b   :  { %v555_v20 = vpop.f32.mrb[20].mxu1  ;;  %v514_v39 = vpop.f32.mrb[20].mxu0 }
 0x13c   :  { %v563_v34 = vadd.f32 %v555_v20, %v277_v5  ;;  %v2365_v42 = vpop.f32.mrb[21].mxu1  ;;  %v561_v55 = vadd.f32 %v514_v39, %v194_v9  ;;  %v516_v46 = vpop.f32.mrb[21].mxu0 }
 0x13d   :  { %v558_v1 = vpop.f32.mrb[22].mxu1  ;;  %v562_v41 = vadd.f32 %v516_v46, %v196_v24  ;;  %v518_v61 = vpop.f32.mrb[22].mxu0 }
 0x13e   :  { %v2159_v0 = vmul.f32 -1.442695, %v563_v34  ;;  %v2366_v2 = vpop.f32.mrb[23].mxu1  ;;  %v519_v50 = vpop.f32.mrb[23].mxu0 }
 0x13f   :  { %v2158_v47 = vmul.f32 -1.442695, %v562_v41  ;;  %v2157_v50 = vmul.f32 -1.442695, %v561_v55 }
 0x140   :  { %2593 = vpow2.f32 %v2159_v0 }
 0x141   :  { %2595 = vpow2.f32 %v2158_v47 }
 0x14a   :  { %v2594_v48 = vpop.eup %2593 }
 0x14b   :  { %v575_v49 = vadd.f32 1.0, %v2594_v48  ;;  %v2596_v51 = vpop.eup %2595  ;;  %v3802_v48 = vlaneseq }
 0x14c   :  { %v574_v59 = vadd.f32 1.0, %v2596_v51 }
 0x14d   :  { %2597 = vrcp.f32 %v575_v49  ;;  %v3259_v49 = vand.u32 127, %v3802_v48 }
 0x14e   :  { %2599 = vrcp.f32 %v574_v59 }
 0x14f   :  { %2601 = vpow2.f32 %v2157_v50  ;;  %vm371_vm3 = vcmp.lt.s32.totalorder %v3259_v49, 32  ;;  %vm374_vm5 = vcmp.lt.s32.totalorder %v3259_v49, 64 }
 0x157   :  { %v2598_v52 = vpop.eup %2597 }
 0x158   :  { %v2600_v54 = vpop.eup %2599  ;;  %v583_v20 = vmul.f32 2.0, %v2598_v52 }
 0x159   :  { %v582_v5 = vmul.f32 2.0, %v2600_v54  ;;  %v2602_v0 = vpop.eup %2601  ;;  %v587_v42 = vmul.f32 0.0, %v2600_v54  ;;  %v3803_v54 = vmov 0.0  }
 0x15a   :  { %v2161_v1 = vadd.f32 -1.0, %v583_v20  ;;  %v573_v41 = vadd.f32 1.0, %v2602_v0 }
 0x15b   :  { %v2160_v9 = vadd.f32 -1.0, %v582_v5 }
 0x15c   :  { %2603 = vrcp.f32 %v573_v41 }
 0x15d   :  { %590 = vrot.lane.b32.xlu0 %v2160_v9, %s2842_s15  ;;  %v3265_v9 = vsel %vm371_vm3, 1.0, %v3803_v54 }
 0x161   :  { %592 = vrot.lane.b32.xlu0 %v2161_v1, %s2842_s15 }
 0x166   :  { %v2604_v34 = vpop.eup %2603 }
 0x167   :  { %v586_v46 = vmul.f32 0.0, %v2604_v34 }
 0x1cf   :  { %v591_v2 = vpop.permute.xlu0 %590 }
 0x1d3   :  { %v593_v24 = vpop.permute.xlu0 %592 }
 0x1d4   :  { %v595_v59 = vsel %vm594_vm2, %v591_v2, %v593_v24 }
 0x1d5   :  { %v597_v39 = vmul.f32 %v2604_v34, %v595_v59 }
 0x1d7   :  { %599 = vrot.lane.b32.xlu1 %v597_v39, %s2851_s3 }
 0x249   :  { %v600_v61 = vpop.permute.xlu1 %599 }
 0x24a   :  { %v3252_v47 = vadd.f32 %v600_v61, %v586_v46  ;;  %v3254_v55 = vadd.f32 %v600_v61, %v587_v42 }
 0x24c   :  { %2605 = vtanh.f32 %v3252_v47 }
 0x24d   :  { %2607 = vtanh.f32 %v3254_v55 }
 0x256   :  { %v2606_v51 = vpop.eup %2605 }
 0x257   :  { %v2608_v5 = vpop.eup %2607  ;;  %608 = vrot.lane.b32.xlu1 %v2606_v51, %s2842_s15 }
 0x258   :  { %610 = vrot.lane.b32.xlu0 %v2608_v5, %s2842_s15 }
 0x25b   :  { %616 = vrot.lane.b32.xlu1 %v3265_v9, %s2852_s28 }
 0x2c9   :  { %v609_v20 = vpop.permute.xlu1 %608 }
 0x2ca   :  { %v611_v1 = vpop.permute.xlu0 %610 }
 0x2cb   :  { %v612_v50 = vsel %vm594_vm2, %v609_v20, %v611_v1 }
 0x2cc   :  { %v614_v0 = vmul.f32 %v2598_v52, %v612_v50  ;;  %v3804_v52 = vmov 0  }
 0x2cd   :  { %v617_v41 = vpop.permute.xlu1 %616 }
 0x2ce   :  { %v619_v2 = vmul.f32 %v617_v41, %v614_v0 }
 0x2d0   :  { %v628_v24 = vpack.c.bf16 %v619_v2, %v619_v2 }
 0x2d2   :  { %630 = vrot.lane.b32.xlu0 %v628_v24, %s2851_s3 }
 0x344   :  { %v631_v34 = vpop.permute.xlu0 %630 }
 0x345   :  { %2162 = vmatmul.mubr.msk.bf16.vlgmr.msra.gmra.mrb[24].mxu0 %vm476_vm4, %v631_v34  ;;  %2380 = vmatmul.mubr.msk.bf16.vlgmr.msra.gmra.mrb[24].mxu1 %vm476_vm4, %v631_v34 }
 0x346   :  { %790 = vmatpush1.bf16.msra.mxu0 %v2959_v12  ;;  %2384 = vmatpush3.bf16.msra.mxu1 %v2965_v13 }
 0x347   :  { %791 = vmatprep.subr.bf16.mxu0 %v2971_v14  ;;  %2385 = vmatprep.subr.bf16.mxu1 %v3803_v54 }
 0x348   :  { %821 = vmatprep.mubr.bf16.mxu0 %v3804_v52  ;;  %2395 = vmatprep.mubr.msk.bf16.mxu1 %vm2849_vm0, %v3803_v54 }
 0x34a   :  { %792 = vmatpush1.bf16.msra.mxu0 %v2988_v17  ;;  %2386 = vmatpush3.bf16.msra.mxu1 %v2993_v18 }
 0x34b   :  { %793 = vmatprep.subr.bf16.mxu0 %v3000_v19  ;;  %2387 = vmatprep.subr.bf16.mxu1 %v3803_v54 }
 0x34e   :  { %794 = vmatpush1.bf16.msra.mxu0 %v3008_v21  ;;  %2388 = vmatpush3.bf16.msra.mxu1 %v3020_v23 }
 0x34f   :  { %795 = vmatprep.subr.bf16.mxu0 %v3015_v22  ;;  %2389 = vmatprep.subr.bf16.mxu1 %v3803_v54 }
 0x352   :  { %796 = vmatpush1.bf16.msra.mxu0 %v3037_v26  ;;  %2390 = vmatpush3.bf16.msra.mxu1 %v3042_v27 }
 0x353   :  { %797 = vmatprep.subr.bf16.mxu0 %v3049_v28  ;;  %2391 = vmatprep.subr.bf16.mxu1 %v3803_v54 }
 0x356   :  { %798 = vmatpush1.bf16.msra.mxu0 %v3055_v30  ;;  %2392 = vmatpush3.bf16.msra.mxu1 %v3060_v31 }
 0x357   :  { %799 = vmatprep.subr.bf16.mxu0 %v3065_v32  ;;  %2393 = vmatprep.subr.bf16.mxu1 %v3803_v54 }
 0x35a   :  { %800 = vmatpush1.bf16.msra.mxu0 %v3081_v35  ;;  %2394 = vmatpush3.bf16.msra.mxu1 %v3093_v36 }
 0x35b   :  { %933 = vmatprep.subr.bf16.mxu0 %v2954_v11  ;;  %2399 = vmatprep.subr.bf16.mxu1 %v3803_v54 }
 0x418   :  { %v669_v59 = vpop.f32.mrb[24].mxu0  ;;  %v710_v39 = vpop.f32.mrb[24].mxu1 }
 0x419   :  { %v716_v42 = vadd.f32 %v669_v59, %v3165_v58  ;;  %v718_v46 = vadd.f32 %v710_v39, %v3162_v56  ;;  %v671_v61 = vpop.f32.mrb[25].mxu0  ;;  %v2381_v48 = vpop.f32.mrb[25].mxu1 }
 0x41a   :  { %v717_v51 = vadd.f32 %v671_v61, %v3168_v60  ;;  %v673_v5 = vpop.f32.mrb[26].mxu0  ;;  %v713_v20 = vpop.f32.mrb[26].mxu1 }
 0x41b   :  { %v2166_v1 = vmul.f32 -1.442695, %v718_v46  ;;  %v674_v50 = vpop.f32.mrb[27].mxu0  ;;  %v2382_v0 = vpop.f32.mrb[27].mxu1  ;;  %v2164_v46 = vmul.f32 -1.442695, %v716_v42 }
 0x41c   :  { %v2165_v41 = vmul.f32 -1.442695, %v717_v51 }
 0x41d   :  { %2609 = vpow2.f32 %v2166_v1 }
 0x41e   :  { %2611 = vpow2.f32 %v2165_v41 }
 0x427   :  { %v2610_v2 = vpop.eup %2609 }
 0x428   :  { %v2612_v24 = vpop.eup %2611  ;;  %v730_v34 = vadd.f32 1.0, %v2610_v2 }
 0x429   :  { %v729_v44 = vadd.f32 1.0, %v2612_v24 }
 0x42a   :  { %2613 = vrcp.f32 %v730_v34 }
 0x42b   :  { %2615 = vrcp.f32 %v729_v44 }
 0x42c   :  { %2617 = vpow2.f32 %v2164_v46 }
 0x434   :  { %v2614_v58 = vpop.eup %2613 }
 0x435   :  { %v2616_v56 = vpop.eup %2615  ;;  %v738_v59 = vmul.f32 2.0, %v2614_v58 }
 0x436   :  { %v737_v39 = vmul.f32 2.0, %v2616_v56  ;;  %v2618_v61 = vpop.eup %2617 }
 0x437   :  { %v2168_v48 = vadd.f32 -1.0, %v738_v59  ;;  %v728_v51 = vadd.f32 1.0, %v2618_v61 }
 0x438   :  { %v2167_v60 = vadd.f32 -1.0, %v737_v39 }
 0x439   :  { %747 = vrot.lane.b32.xlu0 %v2168_v48, %s2842_s15  ;;  %2619 = vrcp.f32 %v728_v51 }
 0x43a   :  { %745 = vrot.lane.b32.xlu1 %v2167_v60, %s2842_s15 }
 0x43e   :  { %620 = vrot.lane.b32.xlu1 %v3265_v9, %s2851_s3 }
 0x443   :  { %v2620_v20 = vpop.eup %2619 }
 0x4ab   :  { %v748_v5 = vpop.permute.xlu0 %747 }
 0x4ac   :  { %v746_v44 = vpop.permute.xlu1 %745 }
 0x4ad   :  { %v749_v1 = vsel %vm594_vm2, %v746_v44, %v748_v5 }
 0x4ae   :  { %v751_v50 = vmul.f32 %v2620_v20, %v749_v1 }
 0x4b0   :  { %753 = vrot.lane.b32.xlu0 %v751_v50, %s2851_s3  ;;  %v621_v0 = vpop.permute.xlu1 %620 }
 0x4b1   :  { %v623_v41 = vmul.f32 %v621_v0, %v3252_v47  ;;  %v624_v2 = vmul.f32 %v621_v0, %v3254_v55  ;;  %v3321_v47 = vsel %vm374_vm5, 1.0, %v3803_v54 }
 0x4b3   :  { %v741_v24 = vmul.f32 %v2620_v20, %v623_v41  ;;  %v742_v9 = vmul.f32 %v2616_v56, %v624_v2 }
 0x522   :  { %v754_v42 = vpop.permute.xlu0 %753 }
 0x523   :  { %v3311_v34 = vadd.f32 %v754_v42, %v741_v24  ;;  %v3313_v59 = vadd.f32 %v754_v42, %v742_v9 }
 0x525   :  { %2621 = vtanh.f32 %v3311_v34 }
 0x526   :  { %2623 = vtanh.f32 %v3313_v59 }
 0x52f   :  { %v2622_v39 = vpop.eup %2621 }
 0x530   :  { %v2624_v48 = vpop.eup %2623  ;;  %762 = vrot.lane.b32.xlu1 %v2622_v39, %s2842_s15 }
 0x531   :  { %764 = vrot.lane.b32.xlu0 %v2624_v48, %s2842_s15 }
 0x534   :  { %770 = vrot.lane.b32.xlu1 %v3321_v47, %s2852_s28 }
 0x5a2   :  { %v763_v55 = vpop.permute.xlu1 %762 }
 0x5a3   :  { %v765_v56 = vpop.permute.xlu0 %764 }
 0x5a4   :  { %v766_v60 = vsel %vm594_vm2, %v763_v55, %v765_v56 }
 0x5a5   :  { %v768_v46 = vmul.f32 %v2614_v58, %v766_v60 }
 0x5a6   :  { %v771_v61 = vpop.permute.xlu1 %770 }
 0x5a7   :  { %v773_v51 = vmul.f32 %v771_v61, %v768_v46 }
 0x5a9   :  { %v782_v49 = vpack.c.bf16 %v773_v51, %v773_v51 }
 0x5ab   :  { %784 = vrot.lane.b32.xlu0 %v782_v49, %s2851_s3 }
 0x61d   :  { %v785_v5 = vpop.permute.xlu0 %784 }
 0x61e   :  { %2169 = vmatmul.mubr.msk.bf16.vlgmr.msra.gmra.mrb[28].mxu0 %vm476_vm4, %v785_v5  ;;  %2396 = vmatmul.mubr.msk.bf16.vlgmr.msra.gmra.mrb[28].mxu1 %vm476_vm4, %v785_v5 }
 0x61f   :  { %934 = vmatpush1.bf16.msra.mxu0 %v2959_v12  ;;  %2400 = vmatpush3.bf16.msra.mxu1 %v2965_v13 }
 0x620   :  { %935 = vmatprep.subr.bf16.mxu0 %v2971_v14  ;;  %2401 = vmatprep.subr.bf16.mxu1 %v3803_v54 }
 0x621   :  { %965 = vmatprep.mubr.bf16.mxu0 %v3804_v52  ;;  %2411 = vmatprep.mubr.msk.bf16.mxu1 %vm2849_vm0, %v3803_v54 }
 0x623   :  { %936 = vmatpush1.bf16.msra.mxu0 %v2988_v17  ;;  %2402 = vmatpush3.bf16.msra.mxu1 %v2993_v18 }
 0x624   :  { %937 = vmatprep.subr.bf16.mxu0 %v3000_v19  ;;  %2403 = vmatprep.subr.bf16.mxu1 %v3803_v54 }
 0x627   :  { %938 = vmatpush1.bf16.msra.mxu0 %v3008_v21  ;;  %2404 = vmatpush3.bf16.msra.mxu1 %v3020_v23 }
 0x628   :  { %939 = vmatprep.subr.bf16.mxu0 %v3015_v22  ;;  %2405 = vmatprep.subr.bf16.mxu1 %v3803_v54 }
 0x62b   :  { %940 = vmatpush1.bf16.msra.mxu0 %v3037_v26  ;;  %2406 = vmatpush3.bf16.msra.mxu1 %v3042_v27 }
 0x62c   :  { %941 = vmatprep.subr.bf16.mxu0 %v3049_v28  ;;  %2407 = vmatprep.subr.bf16.mxu1 %v3803_v54 }
 0x62f   :  { %942 = vmatpush1.bf16.msra.mxu0 %v3055_v30  ;;  %2408 = vmatpush3.bf16.msra.mxu1 %v3060_v31 }
 0x630   :  { %943 = vmatprep.subr.bf16.mxu0 %v3065_v32  ;;  %2409 = vmatprep.subr.bf16.mxu1 %v3803_v54 }
 0x633   :  { %944 = vmatpush1.bf16.msra.mxu0 %v3081_v35  ;;  %2410 = vmatpush3.bf16.msra.mxu1 %v3093_v36 }
 0x634   :  { %1077 = vmatprep.subr.bf16.mxu0 %v2954_v11  ;;  %2415 = vmatprep.subr.bf16.mxu1 %v3803_v54 }
 0x6f1   :  { %v823_v58 = vpop.f32.mrb[28].mxu0  ;;  %v864_v44 = vpop.f32.mrb[28].mxu1 }
 0x6f2   :  { %v870_v20 = vadd.f32 %v823_v58, %v3174_v3  ;;  %v872_v1 = vadd.f32 %v864_v44, %v3171_v63  ;;  %v825_v50 = vpop.f32.mrb[29].mxu0  ;;  %v2397_v0 = vpop.f32.mrb[29].mxu1 }
 0x6f3   :  { %v871_v41 = vadd.f32 %v825_v50, %v3177_v6  ;;  %v827_v2 = vpop.f32.mrb[30].mxu0  ;;  %v867_v24 = vpop.f32.mrb[30].mxu1 }
 0x6f4   :  { %v2173_v9 = vmul.f32 -1.442695, %v872_v1  ;;  %v828_v42 = vpop.f32.mrb[31].mxu0  ;;  %v2398_v39 = vpop.f32.mrb[31].mxu1  ;;  %v2171_v5 = vmul.f32 -1.442695, %v870_v20 }
 0x6f5   :  { %v2172_v48 = vmul.f32 -1.442695, %v871_v41 }
 0x6f6   :  { %2625 = vpow2.f32 %v2173_v9 }
 0x6f7   :  { %2627 = vpow2.f32 %v2172_v48 }
 0x700   :  { %v2626_v55 = vpop.eup %2625 }
 0x701   :  { %v2628_v56 = vpop.eup %2627  ;;  %v884_v60 = vadd.f32 1.0, %v2626_v55 }
 0x702   :  { %v883_v46 = vadd.f32 1.0, %v2628_v56 }
 0x703   :  { %2629 = vrcp.f32 %v884_v60 }
 0x704   :  { %2631 = vrcp.f32 %v883_v46 }
 0x705   :  { %2633 = vpow2.f32 %v2171_v5 }
 0x70d   :  { %v2630_v3 = vpop.eup %2629 }
 0x70e   :  { %v2632_v63 = vpop.eup %2631  ;;  %v892_v61 = vmul.f32 2.0, %v2630_v3 }
 0x70f   :  { %v891_v51 = vmul.f32 2.0, %v2632_v63  ;;  %v2634_v58 = vpop.eup %2633 }
 0x710   :  { %v2175_v49 = vadd.f32 -1.0, %v892_v61  ;;  %v882_v44 = vadd.f32 1.0, %v2634_v58 }
 0x711   :  { %v2174_v6 = vadd.f32 -1.0, %v891_v51 }
 0x712   :  { %901 = vrot.lane.b32.xlu0 %v2175_v49, %s2842_s15  ;;  %2635 = vrcp.f32 %v882_v44 }
 0x713   :  { %899 = vrot.lane.b32.xlu1 %v2174_v6, %s2842_s15 }
 0x717   :  { %774 = vrot.lane.b32.xlu1 %v3321_v47, %s2851_s3 }
 0x71c   :  { %v2636_v0 = vpop.eup %2635 }
 0x784   :  { %v902_v1 = vpop.permute.xlu0 %901 }
 0x785   :  { %v900_v50 = vpop.permute.xlu1 %899 }
 0x786   :  { %v903_v41 = vsel %vm594_vm2, %v900_v50, %v902_v1 }
 0x787   :  { %v905_v2 = vmul.f32 %v2636_v0, %v903_v41 }
 0x789   :  { %907 = vrot.lane.b32.xlu0 %v905_v2, %s2851_s3  ;;  %v775_v24 = vpop.permute.xlu1 %774 }
 0x78a   :  { %v777_v9 = vmul.f32 %v775_v24, %v3311_v34  ;;  %v778_v42 = vmul.f32 %v775_v24, %v3313_v59 }
 0x78c   :  { %v895_v39 = vmul.f32 %v2636_v0, %v777_v9  ;;  %v896_v47 = vmul.f32 %v2632_v63, %v778_v42 }
 0x7fb   :  { %v908_v20 = vpop.permute.xlu0 %907 }
 0x7fc   :  { %v3367_v48 = vadd.f32 %v908_v20, %v895_v39  ;;  %v3369_v55 = vadd.f32 %v908_v20, %v896_v47 }
 0x7fe   :  { %2637 = vtanh.f32 %v3367_v48 }
 0x7ff   :  { %2639 = vtanh.f32 %v3369_v55 }
 0x808   :  { %v2638_v56 = vpop.eup %2637 }
 0x809   :  { %v2640_v60 = vpop.eup %2639  ;;  %916 = vrot.lane.b32.xlu1 %v2638_v56, %s2842_s15 }
 0x80a   :  { %918 = vrot.lane.b32.xlu0 %v2640_v60, %s2842_s15 }
 0x87b   :  { %v917_v34 = vpop.permute.xlu1 %916 }
 0x87c   :  { %v919_v46 = vpop.permute.xlu0 %918 }
 0x87d   :  { %v920_v59 = vsel %vm594_vm2, %v917_v34, %v919_v46 }
 0x87e   :  { %v922_v63 = vmul.f32 %v2630_v3, %v920_v59 }
 0x880   :  { %v926_v61 = vpack.c.bf16 %v922_v63, %v922_v63 }
 0x882   :  { %928 = vrot.lane.b32.xlu1 %v926_v61, %s2851_s3  ;;  %v3430_v61 = vld [vmem:[%s3786_s2] ss:$12 sps:$4 sm:$0xff]  }
 0x8f4   :  { %v929_v51 = vpop.permute.xlu1 %928 }
 0x8f5   :  { %2176 = vmatmul.mubr.msk.bf16.vlgmr.msra.gmra.mrb[32].mxu0 %vm476_vm4, %v929_v51  ;;  %2412 = vmatmul.mubr.msk.bf16.vlgmr.msra.gmra.mrb[32].mxu1 %vm476_vm4, %v929_v51  ;;  %v3436_v51 = vld [vmem:[%s3786_s2 + $0x8] ss:$12 sps:$4 sm:$0xff]  }
 0x8f6   :  { %1078 = vmatpush1.bf16.msra.mxu0 %v2959_v12  ;;  %2416 = vmatpush3.bf16.msra.mxu1 %v2965_v13 }
 0x8f7   :  { %1079 = vmatprep.subr.bf16.mxu0 %v2971_v14  ;;  %2417 = vmatprep.subr.bf16.mxu1 %v3803_v54 }
 0x8f8   :  { %1109 = vmatprep.mubr.bf16.mxu0 %v3804_v52  ;;  %2427 = vmatprep.mubr.msk.bf16.mxu1 %vm2849_vm0, %v3803_v54 }
 0x8fa   :  { %1080 = vmatpush1.bf16.msra.mxu0 %v2988_v17  ;;  %2418 = vmatpush3.bf16.msra.mxu1 %v2993_v18 }
 0x8fb   :  { %1081 = vmatprep.subr.bf16.mxu0 %v3000_v19  ;;  %2419 = vmatprep.subr.bf16.mxu1 %v3803_v54 }
 0x8fe   :  { %1082 = vmatpush1.bf16.msra.mxu0 %v3008_v21  ;;  %2420 = vmatpush3.bf16.msra.mxu1 %v3020_v23 }
 0x8ff   :  { %1083 = vmatprep.subr.bf16.mxu0 %v3015_v22  ;;  %2421 = vmatprep.subr.bf16.mxu1 %v3803_v54 }
 0x902   :  { %1084 = vmatpush1.bf16.msra.mxu0 %v3037_v26  ;;  %2422 = vmatpush3.bf16.msra.mxu1 %v3042_v27 }
 0x903   :  { %1085 = vmatprep.subr.bf16.mxu0 %v3049_v28  ;;  %2423 = vmatprep.subr.bf16.mxu1 %v3803_v54 }
 0x906   :  { %1086 = vmatpush1.bf16.msra.mxu0 %v3055_v30  ;;  %2424 = vmatpush3.bf16.msra.mxu1 %v3060_v31 }
 0x907   :  { %1087 = vmatprep.subr.bf16.mxu0 %v3065_v32  ;;  %2425 = vmatprep.subr.bf16.mxu1 %v3803_v54 }
 0x90a   :  { %1088 = vmatpush1.bf16.msra.mxu0 %v3081_v35  ;;  %2426 = vmatpush3.bf16.msra.mxu1 %v3093_v36 }
 0x90b   :  { %1221 = vmatprep.subr.bf16.mxu0 %v2954_v11  ;;  %2431 = vmatprep.subr.bf16.mxu1 %v3803_v54 }
 0x9c8   :  { %v967_v12 = vpop.f32.mrb[32].mxu0  ;;  %v1008_v13 = vpop.f32.mrb[32].mxu1 }
 0x9c9   :  { %v1014_v14 = vadd.f32 %v967_v12, %v3183_v10  ;;  %v1016_v17 = vadd.f32 %v1008_v13, %v3180_v8  ;;  %v969_v18 = vpop.f32.mrb[33].mxu0  ;;  %v2413_v19 = vpop.f32.mrb[33].mxu1  ;;  %v3442_v12 = vld [vmem:[%s3786_s2 + $0x1c] ss:$12 sps:$4 sm:$0xff]   ;;  %v3452_v13 = vld [vmem:[%s3786_s2 + $0x18] ss:$12 sps:$4 sm:$0xff]  }
 0x9ca   :  { %v1015_v21 = vadd.f32 %v969_v18, %v3186_v16  ;;  %v971_v22 = vpop.f32.mrb[34].mxu0  ;;  %v1011_v23 = vpop.f32.mrb[34].mxu1  ;;  %v3471_v18 = vld [vmem:[%s3786_s2 + $0x30] ss:$12 sps:$4 sm:$0xff]   ;;  %v3477_v19 = vld [vmem:[%s3786_s2 + $0x38] ss:$12 sps:$4 sm:$0xff]  }
 0x9cb   :  { %v2180_v26 = vmul.f32 -1.442695, %v1016_v17  ;;  %v972_v27 = vpop.f32.mrb[35].mxu0  ;;  %v2414_v28 = vpop.f32.mrb[35].mxu1  ;;  %v2178_v58 = vmul.f32 -1.442695, %v1014_v14 }
 0x9cc   :  { %v2179_v30 = vmul.f32 -1.442695, %v1015_v21  ;;  %v3458_v14 = vld [vmem:[%s3786_s2 + $0x20] ss:$12 sps:$4 sm:$0xff]   ;;  %v3490_v22 = vld [vmem:[%s3786_s2 + $0x48] ss:$12 sps:$4 sm:$0xff]  }
 0x9cd   :  { %2641 = vpow2.f32 %v2180_v26  ;;  %v3464_v17 = vld [vmem:[%s3786_s2 + $0x34] ss:$12 sps:$4 sm:$0xff]   ;;  %v3483_v21 = vld [vmem:[%s3786_s2 + $0x4c] ss:$12 sps:$4 sm:$0xff]   ;;  %v3496_v23 = vld [vmem:[%s3786_s2 + $0x50] ss:$12 sps:$4 sm:$0xff]  }
 0x9ce   :  { %2643 = vpow2.f32 %v2179_v30  ;;  %v3502_v26 = vld [vmem:[%s3786_s2 + $0x64] ss:$12 sps:$4 sm:$0xff]   ;;  %v3509_v27 = vld [vmem:[%s3786_s2 + $0x60] ss:$12 sps:$4 sm:$0xff]   ;;  %v3515_v28 = vld [vmem:[%s3786_s2 + $0x68] ss:$12 sps:$4 sm:$0xff]  }
 0x9cf   :  { %v3521_v30 = vld [vmem:[%s3786_s2 + $0x7c] ss:$12 sps:$4 sm:$0xff]  }
 0x9d7   :  { %v2642_v11 = vpop.eup %2641 }
 0x9d8   :  { %v2644_v31 = vpop.eup %2643  ;;  %v1028_v32 = vadd.f32 1.0, %v2642_v11  ;;  %v3530_v11 = vld [vmem:[%s3786_s2 + $0x4] ss:$12 sps:$4 sm:$0xff]  }
 0x9d9   :  { %v1027_v3 = vadd.f32 1.0, %v2644_v31 }
 0x9da   :  { %2645 = vrcp.f32 %v1028_v32 }
 0x9db   :  { %2647 = vrcp.f32 %v1027_v3 }
 0x9dc   :  { %2649 = vpow2.f32 %v2178_v58 }
 0x9e4   :  { %v2646_v10 = vpop.eup %2645 }
 0x9e5   :  { %v2648_v8 = vpop.eup %2647  ;;  %v1036_v49 = vmul.f32 2.0, %v2646_v10 }
 0x9e6   :  { %v1035_v6 = vmul.f32 2.0, %v2648_v8  ;;  %v2650_v44 = vpop.eup %2649  ;;  %v1040_v42 = vmul.f32 %v2648_v8, %v3369_v55 }
 0x9e7   :  { %v2182_v5 = vadd.f32 -1.0, %v1036_v49  ;;  %v1026_v1 = vadd.f32 1.0, %v2650_v44 }
 0x9e8   :  { %v2181_v16 = vadd.f32 -1.0, %v1035_v6 }
 0x9e9   :  { %1045 = vrot.lane.b32.xlu1 %v2182_v5, %s2842_s15  ;;  %2651 = vrcp.f32 %v1026_v1 }
 0x9ea   :  { %1043 = vrot.lane.b32.xlu0 %v2181_v16, %s2842_s15 }
 0x9f3   :  { %v2652_v41 = vpop.eup %2651 }
 0x9f4   :  { %v1039_v9 = vmul.f32 %v2652_v41, %v3367_v48 }
 0xa5b   :  { %v1046_v50 = vpop.permute.xlu1 %1045 }
 0xa5c   :  { %v1044_v0 = vpop.permute.xlu0 %1043 }
 0xa5d   :  { %v1047_v2 = vsel %vm594_vm2, %v1044_v0, %v1046_v50 }
 0xa5e   :  { %v1049_v24 = vmul.f32 %v2652_v41, %v1047_v2 }
 0xa60   :  { %1051 = vrot.lane.b32.xlu0 %v1049_v24, %s2851_s3 }
 0xad2   :  { %v1052_v39 = vpop.permute.xlu0 %1051 }
 0xad3   :  { %v3415_v47 = vadd.f32 %v1052_v39, %v1039_v9  ;;  %v3417_v20 = vadd.f32 %v1052_v39, %v1040_v42 }
 0xad5   :  { %2653 = vtanh.f32 %v3415_v47 }
 0xad6   :  { %2655 = vtanh.f32 %v3417_v20 }
 0xadf   :  { %v2654_v56 = vpop.eup %2653 }
 0xae0   :  { %v2656_v60 = vpop.eup %2655  ;;  %1060 = vrot.lane.b32.xlu1 %v2654_v56, %s2842_s15 }
 0xae1   :  { %1062 = vrot.lane.b32.xlu0 %v2656_v60, %s2842_s15 }
 0xb52   :  { %v1061_v34 = vpop.permute.xlu1 %1060 }
 0xb53   :  { %v1063_v46 = vpop.permute.xlu0 %1062 }
 0xb54   :  { %v1064_v48 = vsel %vm594_vm2, %v1061_v34, %v1063_v46 }
 0xb55   :  { %v1066_v55 = vmul.f32 %v2646_v10, %v1064_v48 }
 0xb57   :  { %v1070_v59 = vpack.c.bf16 %v1066_v55, %v1066_v55 }
 0xb59   :  { %1072 = vrot.lane.b32.xlu1 %v1070_v59, %s2851_s3 }
 0xbcb   :  { %v1073_v63 = vpop.permute.xlu1 %1072 }
 0xbcc   :  { %2183 = vmatmul.mubr.msk.bf16.vlgmr.msra.gmra.mrb[36].mxu0 %vm476_vm4, %v1073_v63  ;;  %2428 = vmatmul.mubr.msk.bf16.vlgmr.msra.gmra.mrb[36].mxu1 %vm476_vm4, %v1073_v63 }
 0xbcd   :  { %1222 = vmatpush1.bf16.msra.mxu0 %v3430_v61  ;;  %2432 = vmatpush3.bf16.msra.mxu1 %v3436_v51 }
 0xbce   :  { %1223 = vmatprep.subr.bf16.mxu0 %v3442_v12  ;;  %2433 = vmatprep.subr.bf16.mxu1 %v3803_v54 }
 0xbcf   :  { %1253 = vmatprep.mubr.bf16.mxu0 %v3804_v52  ;;  %2443 = vmatprep.mubr.msk.bf16.mxu1 %vm2849_vm0, %v3803_v54 }
 0xbd1   :  { %1224 = vmatpush1.bf16.msra.mxu0 %v3452_v13  ;;  %2434 = vmatpush3.bf16.msra.mxu1 %v3458_v14 }
 0xbd2   :  { %1225 = vmatprep.subr.bf16.mxu0 %v3464_v17  ;;  %2435 = vmatprep.subr.bf16.mxu1 %v3803_v54 }
 0xbd5   :  { %1226 = vmatpush1.bf16.msra.mxu0 %v3471_v18  ;;  %2436 = vmatpush3.bf16.msra.mxu1 %v3477_v19 }
 0xbd6   :  { %1227 = vmatprep.subr.bf16.mxu0 %v3483_v21  ;;  %2437 = vmatprep.subr.bf16.mxu1 %v3803_v54 }
 0xbd9   :  { %1228 = vmatpush1.bf16.msra.mxu0 %v3490_v22  ;;  %2438 = vmatpush3.bf16.msra.mxu1 %v3496_v23 }
 0xbda   :  { %1229 = vmatprep.subr.bf16.mxu0 %v3502_v26  ;;  %2439 = vmatprep.subr.bf16.mxu1 %v3803_v54 }
 0xbdd   :  { %1230 = vmatpush1.bf16.msra.mxu0 %v3509_v27  ;;  %2440 = vmatpush3.bf16.msra.mxu1 %v3515_v28 }
 0xbde   :  { %1231 = vmatprep.subr.bf16.mxu0 %v3521_v30  ;;  %2441 = vmatprep.subr.bf16.mxu1 %v3803_v54 }
 0xbe1   :  { %1232 = vmatpush1.bf16.msra.mxu0 %v3081_v35  ;;  %2442 = vmatpush3.bf16.msra.mxu1 %v3093_v36 }
 0xbe2   :  { %1365 = vmatprep.subr.bf16.mxu0 %v3530_v11  ;;  %2447 = vmatprep.subr.bf16.mxu1 %v3803_v54 }
 0xc9f   :  { %v1111_v31 = vpop.f32.mrb[36].mxu0  ;;  %v1152_v32 = vpop.f32.mrb[36].mxu1 }
 0xca0   :  { %v1158_v3 = vadd.f32 %v1111_v31, %v3192_v33  ;;  %v1160_v10 = vadd.f32 %v1152_v32, %v3189_v25  ;;  %v1113_v8 = vpop.f32.mrb[37].mxu0  ;;  %v2429_v49 = vpop.f32.mrb[37].mxu1 }
 0xca1   :  { %v1159_v35 = vadd.f32 %v1113_v8, %v3195_v38  ;;  %v1115_v36 = vpop.f32.mrb[38].mxu0  ;;  %v1155_v6 = vpop.f32.mrb[38].mxu1 }
 0xca2   :  { %v2187_v5 = vmul.f32 -1.442695, %v1160_v10  ;;  %v1116_v16 = vpop.f32.mrb[39].mxu0  ;;  %v2430_v58 = vpop.f32.mrb[39].mxu1  ;;  %v2185_v42 = vmul.f32 -1.442695, %v1158_v3 }
 0xca3   :  { %v2186_v44 = vmul.f32 -1.442695, %v1159_v35  ;;  %v3587_v16 = vld [vmem:[%s3786_s2 + $0x80] ss:$12 sps:$4 sm:$0xff]  }
 0xca4   :  { %2657 = vpow2.f32 %v2187_v5  ;;  %v3581_v5 = vld [vmem:[%s3786_s2 + $0x78] ss:$12 sps:$4 sm:$0xff]  }
 0xca5   :  { %2659 = vpow2.f32 %v2186_v44 }
 0xcae   :  { %v2658_v1 = vpop.eup %2657 }
 0xcaf   :  { %v2660_v50 = vpop.eup %2659  ;;  %v1172_v0 = vadd.f32 1.0, %v2658_v1 }
 0xcb0   :  { %v1171_v41 = vadd.f32 1.0, %v2660_v50 }
 0xcb1   :  { %2661 = vrcp.f32 %v1172_v0 }
 0xcb2   :  { %2663 = vrcp.f32 %v1171_v41 }
 0xcb3   :  { %2665 = vpow2.f32 %v2185_v42 }
 0xcbb   :  { %v2662_v33 = vpop.eup %2661 }
 0xcbc   :  { %v2664_v25 = vpop.eup %2663  ;;  %v1180_v2 = vmul.f32 2.0, %v2662_v33 }
 0xcbd   :  { %v1179_v24 = vmul.f32 2.0, %v2664_v25  ;;  %v2666_v39 = vpop.eup %2665  ;;  %v1184_v63 = vmul.f32 %v2664_v25, %v3417_v20 }
 0xcbe   :  { %v2189_v9 = vadd.f32 -1.0, %v1180_v2  ;;  %v1170_v56 = vadd.f32 1.0, %v2666_v39 }
 0xcbf   :  { %v2188_v38 = vadd.f32 -1.0, %v1179_v24 }
 0xcc0   :  { %1189 = vrot.lane.b32.xlu1 %v2189_v9, %s2842_s15  ;;  %2667 = vrcp.f32 %v1170_v56 }
 0xcc1   :  { %1187 = vrot.lane.b32.xlu0 %v2188_v38, %s2842_s15 }
 0xcca   :  { %v2668_v46 = vpop.eup %2667 }
 0xccb   :  { %v1183_v59 = vmul.f32 %v2668_v46, %v3415_v47 }
 0xd32   :  { %v1190_v60 = vpop.permute.xlu1 %1189 }
 0xd33   :  { %v1188_v34 = vpop.permute.xlu0 %1187 }
 0xd34   :  { %v1191_v48 = vsel %vm594_vm2, %v1188_v34, %v1190_v60 }
 0xd35   :  { %v1193_v55 = vmul.f32 %v2668_v46, %v1191_v48 }
 0xd37   :  { %1195 = vrot.lane.b32.xlu0 %v1193_v55, %s2851_s3 }
 0xda9   :  { %v1196_v31 = vpop.permute.xlu0 %1195 }
 0xdaa   :  { %v3543_v32 = vadd.f32 %v1196_v31, %v1183_v59  ;;  %v3545_v3 = vadd.f32 %v1196_v31, %v1184_v63 }
 0xdac   :  { %2669 = vtanh.f32 %v3543_v32 }
 0xdad   :  { %2671 = vtanh.f32 %v3545_v3 }
 0xdb6   :  { %v2670_v10 = vpop.eup %2669 }
 0xdb7   :  { %v2672_v8 = vpop.eup %2671  ;;  %1204 = vrot.lane.b32.xlu1 %v2670_v10, %s2842_s15 }
 0xdb8   :  { %1206 = vrot.lane.b32.xlu0 %v2672_v8, %s2842_s15 }
 0xe29   :  { %v1205_v49 = vpop.permute.xlu1 %1204 }
 0xe2a   :  { %v1207_v35 = vpop.permute.xlu0 %1206 }
 0xe2b   :  { %v1208_v47 = vsel %vm594_vm2, %v1205_v49, %v1207_v35 }
 0xe2c   :  { %v1210_v20 = vmul.f32 %v2662_v33, %v1208_v47 }
 0xe2e   :  { %v1214_v36 = vpack.c.bf16 %v1210_v20, %v1210_v20 }
 0xe30   :  { %1216 = vrot.lane.b32.xlu1 %v1214_v36, %s2851_s3 }
 0xea2   :  { %v1217_v6 = vpop.permute.xlu1 %1216 }
 0xea3   :  { %2190 = vmatmul.mubr.msk.bf16.vlgmr.msra.gmra.mrb[40].mxu0 %vm476_vm4, %v1217_v6  ;;  %2444 = vmatmul.mubr.msk.bf16.vlgmr.msra.gmra.mrb[40].mxu1 %vm476_vm4, %v1217_v6 }
 0xea4   :  { %1366 = vmatpush1.bf16.msra.mxu0 %v3430_v61  ;;  %2448 = vmatpush3.bf16.msra.mxu1 %v3436_v51 }
 0xea5   :  { %1367 = vmatprep.subr.bf16.mxu0 %v3442_v12  ;;  %2449 = vmatprep.subr.bf16.mxu1 %v3803_v54 }
 0xea6   :  { %1397 = vmatprep.mubr.bf16.mxu0 %v3804_v52  ;;  %2459 = vmatprep.mubr.msk.bf16.mxu1 %vm2849_vm0, %v3803_v54 }
 0xea8   :  { %1368 = vmatpush1.bf16.msra.mxu0 %v3452_v13  ;;  %2450 = vmatpush3.bf16.msra.mxu1 %v3458_v14 }
 0xea9   :  { %1369 = vmatprep.subr.bf16.mxu0 %v3464_v17  ;;  %2451 = vmatprep.subr.bf16.mxu1 %v3803_v54 }
 0xeac   :  { %1370 = vmatpush1.bf16.msra.mxu0 %v3471_v18  ;;  %2452 = vmatpush3.bf16.msra.mxu1 %v3477_v19 }
 0xead   :  { %1371 = vmatprep.subr.bf16.mxu0 %v3483_v21  ;;  %2453 = vmatprep.subr.bf16.mxu1 %v3803_v54 }
 0xeb0   :  { %1372 = vmatpush1.bf16.msra.mxu0 %v3490_v22  ;;  %2454 = vmatpush3.bf16.msra.mxu1 %v3496_v23 }
 0xeb1   :  { %1373 = vmatprep.subr.bf16.mxu0 %v3502_v26  ;;  %2455 = vmatprep.subr.bf16.mxu1 %v3803_v54 }
 0xeb4   :  { %1374 = vmatpush1.bf16.msra.mxu0 %v3509_v27  ;;  %2456 = vmatpush3.bf16.msra.mxu1 %v3515_v28 }
 0xeb5   :  { %1375 = vmatprep.subr.bf16.mxu0 %v3521_v30  ;;  %2457 = vmatprep.subr.bf16.mxu1 %v3803_v54 }
 0xeb8   :  { %1376 = vmatpush1.bf16.msra.mxu0 %v3581_v5  ;;  %2458 = vmatpush3.bf16.msra.mxu1 %v3587_v16 }
 0xeb9   :  { %1509 = vmatprep.subr.bf16.mxu0 %v3530_v11  ;;  %2463 = vmatprep.subr.bf16.mxu1 %v3803_v54 }
 0xf76   :  { %v1255_v58 = vpop.f32.mrb[40].mxu0  ;;  %v1296_v44 = vpop.f32.mrb[40].mxu1 }
 0xf77   :  { %v1302_v1 = vadd.f32 %v1255_v58, %v3201_v43  ;;  %v1304_v50 = vadd.f32 %v1296_v44, %v3198_v40  ;;  %v1257_v0 = vpop.f32.mrb[41].mxu0  ;;  %v2445_v41 = vpop.f32.mrb[41].mxu1 }
 0xf78   :  { %v1303_v33 = vadd.f32 %v1257_v0, %v3204_v45  ;;  %v1259_v25 = vpop.f32.mrb[42].mxu0  ;;  %v1299_v2 = vpop.f32.mrb[42].mxu1 }
 0xf79   :  { %v2194_v24 = vmul.f32 -1.442695, %v1304_v50  ;;  %v1260_v9 = vpop.f32.mrb[43].mxu0  ;;  %v2446_v38 = vpop.f32.mrb[43].mxu1  ;;  %v2192_v59 = vmul.f32 -1.442695, %v1302_v1 }
 0xf7a   :  { %v2193_v42 = vmul.f32 -1.442695, %v1303_v33 }
 0xf7b   :  { %2673 = vpow2.f32 %v2194_v24 }
 0xf7c   :  { %2675 = vpow2.f32 %v2193_v42 }
 0xf85   :  { %v2674_v39 = vpop.eup %2673 }
 0xf86   :  { %v2676_v56 = vpop.eup %2675  ;;  %v1316_v60 = vadd.f32 1.0, %v2674_v39 }
 0xf87   :  { %v1315_v34 = vadd.f32 1.0, %v2676_v56 }
 0xf88   :  { %2677 = vrcp.f32 %v1316_v60 }
 0xf89   :  { %2679 = vrcp.f32 %v1315_v34 }
 0xf8a   :  { %2681 = vpow2.f32 %v2192_v59 }
 0xf92   :  { %v2678_v43 = vpop.eup %2677 }
 0xf93   :  { %v2680_v40 = vpop.eup %2679  ;;  %v1324_v46 = vmul.f32 2.0, %v2678_v43 }
 0xf94   :  { %v1323_v48 = vmul.f32 2.0, %v2680_v40  ;;  %v2682_v63 = vpop.eup %2681  ;;  %v1328_v36 = vmul.f32 %v2680_v40, %v3545_v3 }
 0xf95   :  { %v2196_v55 = vadd.f32 -1.0, %v1324_v46  ;;  %v1314_v31 = vadd.f32 1.0, %v2682_v63 }
 0xf96   :  { %v2195_v45 = vadd.f32 -1.0, %v1323_v48 }
 0xf97   :  { %1333 = vrot.lane.b32.xlu1 %v2196_v55, %s2842_s15  ;;  %2683 = vrcp.f32 %v1314_v31 }
 0xf98   :  { %1331 = vrot.lane.b32.xlu0 %v2195_v45, %s2842_s15 }
 0xfa1   :  { %v2684_v49 = vpop.eup %2683 }
 0xfa2   :  { %v1327_v20 = vmul.f32 %v2684_v49, %v3543_v32 }
0x1009   :  { %v1334_v10 = vpop.permute.xlu1 %1333 }
0x100a   :  { %v1332_v8 = vpop.permute.xlu0 %1331 }
0x100b   :  { %v1335_v35 = vsel %vm594_vm2, %v1332_v8, %v1334_v10 }
0x100c   :  { %v1337_v47 = vmul.f32 %v2684_v49, %v1335_v35 }
0x100e   :  { %1339 = vrot.lane.b32.xlu0 %v1337_v47, %s2851_s3 }
0x1080   :  { %v1340_v6 = vpop.permute.xlu0 %1339 }
0x1081   :  { %v3601_v58 = vadd.f32 %v1340_v6, %v1327_v20  ;;  %v3603_v44 = vadd.f32 %v1340_v6, %v1328_v36 }
0x1083   :  { %2685 = vtanh.f32 %v3601_v58 }
0x1084   :  { %2687 = vtanh.f32 %v3603_v44 }
0x108d   :  { %v2686_v1 = vpop.eup %2685 }
0x108e   :  { %v2688_v50 = vpop.eup %2687  ;;  %1348 = vrot.lane.b32.xlu1 %v2686_v1, %s2842_s15 }
0x108f   :  { %1350 = vrot.lane.b32.xlu0 %v2688_v50, %s2842_s15 }
0x1100   :  { %v1349_v0 = vpop.permute.xlu1 %1348 }
0x1101   :  { %v1351_v41 = vpop.permute.xlu0 %1350 }
0x1102   :  { %v1352_v32 = vsel %vm594_vm2, %v1349_v0, %v1351_v41 }
0x1103   :  { %v1354_v3 = vmul.f32 %v2678_v43, %v1352_v32 }
0x1105   :  { %v1358_v33 = vpack.c.bf16 %v1354_v3, %v1354_v3 }
0x1107   :  { %1360 = vrot.lane.b32.xlu1 %v1358_v33, %s2851_s3 }
0x1179   :  { %v1361_v25 = vpop.permute.xlu1 %1360 }
0x117a   :  { %2197 = vmatmul.mubr.msk.bf16.vlgmr.msra.gmra.mrb[44].mxu0 %vm476_vm4, %v1361_v25  ;;  %2460 = vmatmul.mubr.msk.bf16.vlgmr.msra.gmra.mrb[44].mxu1 %vm476_vm4, %v1361_v25 }
0x117b   :  { %1510 = vmatpush1.bf16.msra.mxu0 %v3430_v61  ;;  %2464 = vmatpush3.bf16.msra.mxu1 %v3436_v51 }
0x117c   :  { %1511 = vmatprep.subr.bf16.mxu0 %v3442_v12  ;;  %2465 = vmatprep.subr.bf16.mxu1 %v3803_v54 }
0x117d   :  { %1541 = vmatprep.mubr.bf16.mxu0 %v3804_v52  ;;  %2475 = vmatprep.mubr.msk.bf16.mxu1 %vm2849_vm0, %v3803_v54 }
0x117f   :  { %1512 = vmatpush1.bf16.msra.mxu0 %v3452_v13  ;;  %2466 = vmatpush3.bf16.msra.mxu1 %v3458_v14 }
0x1180   :  { %1513 = vmatprep.subr.bf16.mxu0 %v3464_v17  ;;  %2467 = vmatprep.subr.bf16.mxu1 %v3803_v54 }
0x1183   :  { %1514 = vmatpush1.bf16.msra.mxu0 %v3471_v18  ;;  %2468 = vmatpush3.bf16.msra.mxu1 %v3477_v19 }
0x1184   :  { %1515 = vmatprep.subr.bf16.mxu0 %v3483_v21  ;;  %2469 = vmatprep.subr.bf16.mxu1 %v3803_v54 }
0x1187   :  { %1516 = vmatpush1.bf16.msra.mxu0 %v3490_v22  ;;  %2470 = vmatpush3.bf16.msra.mxu1 %v3496_v23 }
0x1188   :  { %1517 = vmatprep.subr.bf16.mxu0 %v3502_v26  ;;  %2471 = vmatprep.subr.bf16.mxu1 %v3803_v54 }
0x118b   :  { %1518 = vmatpush1.bf16.msra.mxu0 %v3509_v27  ;;  %2472 = vmatpush3.bf16.msra.mxu1 %v3515_v28 }
0x118c   :  { %1519 = vmatprep.subr.bf16.mxu0 %v3521_v30  ;;  %2473 = vmatprep.subr.bf16.mxu1 %v3803_v54 }
0x118f   :  { %1520 = vmatpush1.bf16.msra.mxu0 %v3581_v5  ;;  %2474 = vmatpush3.bf16.msra.mxu1 %v3587_v16 }
0x1190   :  { %1653 = vmatprep.subr.bf16.mxu0 %v3530_v11  ;;  %2479 = vmatprep.subr.bf16.mxu1 %v3803_v54 }
0x124d   :  { %v1399_v2 = vpop.f32.mrb[44].mxu0  ;;  %v1440_v24 = vpop.f32.mrb[44].mxu1 }
0x124e   :  { %v1446_v9 = vadd.f32 %v1399_v2, %v3210_v57  ;;  %v1448_v38 = vadd.f32 %v1440_v24, %v3207_v53  ;;  %v1401_v42 = vpop.f32.mrb[45].mxu0  ;;  %v2461_v39 = vpop.f32.mrb[45].mxu1 }
0x124f   :  { %v1447_v56 = vadd.f32 %v1401_v42, %v3213_v62  ;;  %v1403_v60 = vpop.f32.mrb[46].mxu0  ;;  %v1443_v34 = vpop.f32.mrb[46].mxu1 }
0x1250   :  { %v2201_v43 = vmul.f32 -1.442695, %v1448_v38  ;;  %v1404_v40 = vpop.f32.mrb[47].mxu0  ;;  %v2462_v46 = vpop.f32.mrb[47].mxu1  ;;  %v2199_v49 = vmul.f32 -1.442695, %v1446_v9 }
0x1251   :  { %v2200_v48 = vmul.f32 -1.442695, %v1447_v56 }
0x1252   :  { %2689 = vpow2.f32 %v2201_v43 }
0x1253   :  { %2691 = vpow2.f32 %v2200_v48 }
0x125c   :  { %v2690_v55 = vpop.eup %2689 }
0x125d   :  { %v2692_v45 = vpop.eup %2691  ;;  %v1460_v59 = vadd.f32 1.0, %v2690_v55 }
0x125e   :  { %v1459_v63 = vadd.f32 1.0, %v2692_v45 }
0x125f   :  { %2693 = vrcp.f32 %v1460_v59 }
0x1260   :  { %2695 = vrcp.f32 %v1459_v63 }
0x1261   :  { %2697 = vpow2.f32 %v2199_v49 }
0x1269   :  { %v2694_v57 = vpop.eup %2693 }
0x126a   :  { %v2696_v53 = vpop.eup %2695  ;;  %v1468_v31 = vmul.f32 2.0, %v2694_v57 }
0x126b   :  { %v1467_v10 = vmul.f32 2.0, %v2696_v53  ;;  %v2698_v35 = vpop.eup %2697  ;;  %v1472_v41 = vmul.f32 %v2696_v53, %v3603_v44 }
0x126c   :  { %v2203_v8 = vadd.f32 -1.0, %v1468_v31  ;;  %v1458_v47 = vadd.f32 1.0, %v2698_v35 }
0x126d   :  { %v2202_v62 = vadd.f32 -1.0, %v1467_v10 }
0x126e   :  { %1477 = vrot.lane.b32.xlu1 %v2203_v8, %s2842_s15  ;;  %2699 = vrcp.f32 %v1458_v47 }
0x126f   :  { %1475 = vrot.lane.b32.xlu0 %v2202_v62, %s2842_s15 }
0x1278   :  { %v2700_v6 = vpop.eup %2699 }
0x1279   :  { %v1471_v0 = vmul.f32 %v2700_v6, %v3601_v58 }
0x12e0   :  { %v1478_v20 = vpop.permute.xlu1 %1477 }
0x12e1   :  { %v1476_v36 = vpop.permute.xlu0 %1475 }
0x12e2   :  { %v1479_v1 = vsel %vm594_vm2, %v1476_v36, %v1478_v20 }
0x12e3   :  { %v1481_v50 = vmul.f32 %v2700_v6, %v1479_v1 }
0x12e5   :  { %1483 = vrot.lane.b32.xlu0 %v1481_v50, %s2851_s3 }
0x1357   :  { %v1484_v32 = vpop.permute.xlu0 %1483 }
0x1358   :  { %v3649_v3 = vadd.f32 %v1484_v32, %v1471_v0  ;;  %v3651_v33 = vadd.f32 %v1484_v32, %v1472_v41 }
0x135a   :  { %2701 = vtanh.f32 %v3649_v3 }
0x135b   :  { %2703 = vtanh.f32 %v3651_v33 }
0x1364   :  { %v2702_v25 = vpop.eup %2701 }
0x1365   :  { %v2704_v2 = vpop.eup %2703  ;;  %1492 = vrot.lane.b32.xlu1 %v2702_v25, %s2842_s15 }
0x1366   :  { %1494 = vrot.lane.b32.xlu0 %v2704_v2, %s2842_s15 }
0x13d7   :  { %v1493_v24 = vpop.permute.xlu1 %1492 }
0x13d8   :  { %v1495_v9 = vpop.permute.xlu0 %1494 }
0x13d9   :  { %v1496_v58 = vsel %vm594_vm2, %v1493_v24, %v1495_v9 }
0x13da   :  { %v1498_v44 = vmul.f32 %v2694_v57, %v1496_v58 }
0x13dc   :  { %v1502_v38 = vpack.c.bf16 %v1498_v44, %v1498_v44 }
0x13de   :  { %1504 = vrot.lane.b32.xlu1 %v1502_v38, %s2851_s3 }
0x1450   :  { %v1505_v42 = vpop.permute.xlu1 %1504 }
0x1451   :  { %2204 = vmatmul.mubr.msk.bf16.vlgmr.msra.gmra.mrb[48].mxu0 %vm476_vm4, %v1505_v42  ;;  %2476 = vmatmul.mubr.msk.bf16.vlgmr.msra.gmra.mrb[48].mxu1 %vm476_vm4, %v1505_v42 }
0x1452   :  { %1654 = vmatpush1.bf16.msra.mxu0 %v3430_v61  ;;  %2480 = vmatpush3.bf16.msra.mxu1 %v3436_v51 }
0x1453   :  { %1655 = vmatprep.subr.bf16.mxu0 %v3442_v12  ;;  %2481 = vmatprep.subr.bf16.mxu1 %v3803_v54 }
0x1454   :  { %1685 = vmatprep.mubr.bf16.mxu0 %v3804_v52  ;;  %2491 = vmatprep.mubr.msk.bf16.mxu1 %vm2849_vm0, %v3803_v54 }
0x1456   :  { %1656 = vmatpush1.bf16.msra.mxu0 %v3452_v13  ;;  %2482 = vmatpush3.bf16.msra.mxu1 %v3458_v14 }
0x1457   :  { %1657 = vmatprep.subr.bf16.mxu0 %v3464_v17  ;;  %2483 = vmatprep.subr.bf16.mxu1 %v3803_v54 }
0x145a   :  { %1658 = vmatpush1.bf16.msra.mxu0 %v3471_v18  ;;  %2484 = vmatpush3.bf16.msra.mxu1 %v3477_v19 }
0x145b   :  { %1659 = vmatprep.subr.bf16.mxu0 %v3483_v21  ;;  %2485 = vmatprep.subr.bf16.mxu1 %v3803_v54 }
0x145e   :  { %1660 = vmatpush1.bf16.msra.mxu0 %v3490_v22  ;;  %2486 = vmatpush3.bf16.msra.mxu1 %v3496_v23 }
0x145f   :  { %1661 = vmatprep.subr.bf16.mxu0 %v3502_v26  ;;  %2487 = vmatprep.subr.bf16.mxu1 %v3803_v54 }
0x1462   :  { %1662 = vmatpush1.bf16.msra.mxu0 %v3509_v27  ;;  %2488 = vmatpush3.bf16.msra.mxu1 %v3515_v28 }
0x1463   :  { %1663 = vmatprep.subr.bf16.mxu0 %v3521_v30  ;;  %2489 = vmatprep.subr.bf16.mxu1 %v3803_v54 }
0x1466   :  { %1664 = vmatpush1.bf16.msra.mxu0 %v3581_v5  ;;  %2490 = vmatpush3.bf16.msra.mxu1 %v3587_v16 }
0x1467   :  { %1797 = vmatprep.subr.bf16.mxu0 %v3530_v11  ;;  %2495 = vmatprep.subr.bf16.mxu1 %v3803_v54 }
0x1524   :  { %v1543_v39 = vpop.f32.mrb[48].mxu0  ;;  %v1584_v56 = vpop.f32.mrb[48].mxu1 }
0x1525   :  { %v1590_v60 = vadd.f32 %v1543_v39, %v3219_v7  ;;  %v1592_v34 = vadd.f32 %v1584_v56, %v3216_v4  ;;  %v1545_v43 = vpop.f32.mrb[49].mxu0  ;;  %v2477_v40 = vpop.f32.mrb[49].mxu1 }
0x1526   :  { %v1591_v46 = vadd.f32 %v1545_v43, %v3222_v15  ;;  %v1547_v48 = vpop.f32.mrb[50].mxu0  ;;  %v1587_v55 = vpop.f32.mrb[50].mxu1 }
0x1527   :  { %v2208_v45 = vmul.f32 -1.442695, %v1592_v34  ;;  %v1548_v59 = vpop.f32.mrb[51].mxu0  ;;  %v2478_v63 = vpop.f32.mrb[51].mxu1  ;;  %v2206_v35 = vmul.f32 -1.442695, %v1590_v60 }
0x1528   :  { %v2207_v57 = vmul.f32 -1.442695, %v1591_v46 }
0x1529   :  { %2705 = vpow2.f32 %v2208_v45 }
0x152a   :  { %2707 = vpow2.f32 %v2207_v57 }
0x1533   :  { %v2706_v11 = vpop.eup %2705 }
0x1534   :  { %v2708_v53 = vpop.eup %2707  ;;  %v1604_v31 = vadd.f32 1.0, %v2706_v11 }
0x1535   :  { %v1603_v10 = vadd.f32 1.0, %v2708_v53 }
0x1536   :  { %2709 = vrcp.f32 %v1604_v31 }
0x1537   :  { %2711 = vrcp.f32 %v1603_v10 }
0x1538   :  { %2713 = vpow2.f32 %v2206_v35 }
0x1540   :  { %v2710_v7 = vpop.eup %2709 }
0x1541   :  { %v2712_v4 = vpop.eup %2711  ;;  %v1612_v8 = vmul.f32 2.0, %v2710_v7 }
0x1542   :  { %v1611_v62 = vmul.f32 2.0, %v2712_v4  ;;  %v2714_v47 = vpop.eup %2713  ;;  %v1616_v32 = vmul.f32 %v2712_v4, %v3651_v33 }
0x1543   :  { %v2210_v49 = vadd.f32 -1.0, %v1612_v8  ;;  %v1602_v20 = vadd.f32 1.0, %v2714_v47 }
0x1544   :  { %v2209_v15 = vadd.f32 -1.0, %v1611_v62 }
0x1545   :  { %1621 = vrot.lane.b32.xlu1 %v2210_v49, %s2842_s15  ;;  %2715 = vrcp.f32 %v1602_v20 }
0x1546   :  { %1619 = vrot.lane.b32.xlu0 %v2209_v15, %s2842_s15 }
0x154f   :  { %v2716_v1 = vpop.eup %2715 }
0x1550   :  { %v1615_v41 = vmul.f32 %v2716_v1, %v3649_v3 }
0x15b7   :  { %v1622_v36 = vpop.permute.xlu1 %1621 }
0x15b8   :  { %v1620_v6 = vpop.permute.xlu0 %1619 }
0x15b9   :  { %v1623_v50 = vsel %vm594_vm2, %v1620_v6, %v1622_v36 }
0x15ba   :  { %v1625_v0 = vmul.f32 %v2716_v1, %v1623_v50  ;;  %v3806_v1 = vld [vmem:[#allocation12_spill] sm:$0xff] }
0x15bc   :  { %1627 = vrot.lane.b32.xlu0 %v1625_v0, %s2851_s3  ;;  %v3807_v0 = vld [vmem:[#allocation11_spill] sm:$0xff] }
0x162e   :  { %v1628_v25 = vpop.permute.xlu0 %1627 }
0x162f   :  { %v3697_v2 = vadd.f32 %v1628_v25, %v1615_v41  ;;  %v3699_v24 = vadd.f32 %v1628_v25, %v1616_v32 }
0x1631   :  { %2717 = vtanh.f32 %v3697_v2 }
0x1632   :  { %2719 = vtanh.f32 %v3699_v24 }
0x163b   :  { %v2718_v9 = vpop.eup %2717 }
0x163c   :  { %v2720_v58 = vpop.eup %2719  ;;  %1636 = vrot.lane.b32.xlu1 %v2718_v9, %s2842_s15 }
0x163d   :  { %1638 = vrot.lane.b32.xlu0 %v2720_v58, %s2842_s15 }
0x16ae   :  { %v1637_v44 = vpop.permute.xlu1 %1636 }
0x16af   :  { %v1639_v38 = vpop.permute.xlu0 %1638 }
0x16b0   :  { %v1640_v3 = vsel %vm594_vm2, %v1637_v44, %v1639_v38 }
0x16b1   :  { %v1642_v33 = vmul.f32 %v2710_v7, %v1640_v3 }
0x16b3   :  { %v1646_v42 = vpack.c.bf16 %v1642_v33, %v1642_v33 }
0x16b5   :  { %1648 = vrot.lane.b32.xlu1 %v1646_v42, %s2851_s3 }
0x1727   :  { %v1649_v39 = vpop.permute.xlu1 %1648 }
0x1728   :  { %2211 = vmatmul.mubr.msk.bf16.vlgmr.msra.gmra.mrb[52].mxu0 %vm476_vm4, %v1649_v39  ;;  %2492 = vmatmul.mubr.msk.bf16.vlgmr.msra.gmra.mrb[52].mxu1 %vm476_vm4, %v1649_v39 }
0x1729   :  { %1798 = vmatpush1.bf16.msra.mxu0 %v3430_v61  ;;  %2496 = vmatpush3.bf16.msra.mxu1 %v3436_v51 }
0x172a   :  { %1799 = vmatprep.subr.bf16.mxu0 %v3442_v12  ;;  %2497 = vmatprep.subr.bf16.mxu1 %v3803_v54 }
0x172b   :  { %1829 = vmatprep.mubr.bf16.mxu0 %v3804_v52  ;;  %2507 = vmatprep.mubr.msk.bf16.mxu1 %vm2849_vm0, %v3803_v54 }
0x172d   :  { %1800 = vmatpush1.bf16.msra.mxu0 %v3452_v13  ;;  %2498 = vmatpush3.bf16.msra.mxu1 %v3458_v14 }
0x172e   :  { %1801 = vmatprep.subr.bf16.mxu0 %v3464_v17  ;;  %2499 = vmatprep.subr.bf16.mxu1 %v3803_v54  ;;  %v3805_v17 = vld [vmem:[#allocation10_spill] sm:$0xff] }
0x1731   :  { %1802 = vmatpush1.bf16.msra.mxu0 %v3471_v18  ;;  %2500 = vmatpush3.bf16.msra.mxu1 %v3477_v19 }
0x1732   :  { %1803 = vmatprep.subr.bf16.mxu0 %v3483_v21  ;;  %2501 = vmatprep.subr.bf16.mxu1 %v3803_v54 }
0x1735   :  { %1804 = vmatpush1.bf16.msra.mxu0 %v3490_v22  ;;  %2502 = vmatpush3.bf16.msra.mxu1 %v3496_v23 }
0x1736   :  { %1805 = vmatprep.subr.bf16.mxu0 %v3502_v26  ;;  %2503 = vmatprep.subr.bf16.mxu1 %v3803_v54 }
0x1739   :  { %1806 = vmatpush1.bf16.msra.mxu0 %v3509_v27  ;;  %2504 = vmatpush3.bf16.msra.mxu1 %v3515_v28 }
0x173a   :  { %1807 = vmatprep.subr.bf16.mxu0 %v3521_v30  ;;  %2505 = vmatprep.subr.bf16.mxu1 %v3803_v54 }
0x173d   :  { %1808 = vmatpush1.bf16.msra.mxu0 %v3581_v5  ;;  %2506 = vmatpush3.bf16.msra.mxu1 %v3587_v16 }
0x173e   :  { %2511 = vmatprep.subr.bf16.mxu0 %v3803_v54  ;;  %2519 = vmatprep.subr.bf16.mxu1 %v3803_v54 }
0x17fb   :  { %v1687_v52 = vpop.f32.mrb[52].mxu0  ;;  %v1728_v61 = vpop.f32.mrb[52].mxu1 }
0x17fc   :  { %v1734_v51 = vadd.f32 %v1687_v52, %v3228_v37  ;;  %v1736_v12 = vadd.f32 %v1728_v61, %v3225_v29  ;;  %v1689_v13 = vpop.f32.mrb[53].mxu0  ;;  %v2493_v14 = vpop.f32.mrb[53].mxu1 }
0x17fd   :  { %v1735_v18 = vadd.f32 %v1689_v13, %v3805_v17  ;;  %v1691_v19 = vpop.f32.mrb[54].mxu0  ;;  %v1731_v21 = vpop.f32.mrb[54].mxu1 }
0x17fe   :  { %v2215_v22 = vmul.f32 -1.442695, %v1736_v12  ;;  %v1692_v23 = vpop.f32.mrb[55].mxu0  ;;  %v2494_v26 = vpop.f32.mrb[55].mxu1  ;;  %v2213_v40 = vmul.f32 -1.442695, %v1734_v51 }
0x17ff   :  { %v2214_v27 = vmul.f32 -1.442695, %v1735_v18 }
0x1800   :  { %2721 = vpow2.f32 %v2215_v22 }
0x1801   :  { %2723 = vpow2.f32 %v2214_v27 }
0x180a   :  { %v2722_v28 = vpop.eup %2721 }
0x180b   :  { %v2724_v30 = vpop.eup %2723  ;;  %v1748_v5 = vadd.f32 1.0, %v2722_v28 }
0x180c   :  { %v1747_v16 = vadd.f32 1.0, %v2724_v30 }
0x180d   :  { %2725 = vrcp.f32 %v1748_v5 }
0x180e   :  { %2727 = vrcp.f32 %v1747_v16 }
0x180f   :  { %2729 = vpow2.f32 %v2213_v40 }
0x1817   :  { %v2726_v37 = vpop.eup %2725 }
0x1818   :  { %v2728_v29 = vpop.eup %2727  ;;  %v1756_v56 = vmul.f32 2.0, %v2726_v37 }
0x1819   :  { %v1755_v60 = vmul.f32 2.0, %v2728_v29  ;;  %v2730_v46 = vpop.eup %2729  ;;  %v1760_v53 = vmul.f32 %v2728_v29, %v3699_v24 }
0x181a   :  { %v2217_v34 = vadd.f32 -1.0, %v1756_v56  ;;  %v1746_v48 = vadd.f32 1.0, %v2730_v46  ;;  %v2585_v46 = vld [vmem:[#allocation7] sm:$0xff]  }
0x181b   :  { %v2216_v43 = vadd.f32 -1.0, %v1755_v60  ;;  %v2583_v60 = vld [vmem:[#allocation5] sm:$0xff]  }
0x181c   :  { %1765 = vrot.lane.b32.xlu1 %v2217_v34, %s2842_s15  ;;  %2731 = vrcp.f32 %v1746_v48  ;;  %v2584_v34 = vld [vmem:[#allocation5 + $0x8] sm:$0xff]   ;;  %v2586_v48 = vld [vmem:[#allocation7 + $0x8] sm:$0xff]  }
0x181d   :  { %1763 = vrot.lane.b32.xlu0 %v2216_v43, %s2842_s15 }
0x1826   :  { %v2732_v59 = vpop.eup %2731 }
0x1827   :  { %v1759_v11 = vmul.f32 %v2732_v59, %v3697_v2  ;;  %v3808_v2 = vld [vmem:[#allocation13_spill] sm:$0xff] }
0x188e   :  { %v1766_v55 = vpop.permute.xlu1 %1765 }
0x188f   :  { %v1764_v45 = vpop.permute.xlu0 %1763 }
0x1890   :  { %v1767_v63 = vsel %vm594_vm2, %v1764_v45, %v1766_v55  ;;  %v2587_v45 = vld [vmem:[#allocation7 + $0x10] sm:$0xff]  }
0x1891   :  { %v1769_v57 = vmul.f32 %v2732_v59, %v1767_v63 }
0x1893   :  { %1771 = vrot.lane.b32.xlu0 %v1769_v57, %s2851_s3 }
0x1905   :  { %v1772_v31 = vpop.permute.xlu0 %1771 }
0x1906   :  { %v1774_v10 = vadd.f32 %v1772_v31, %v1759_v11  ;;  %v1775_v7 = vadd.f32 %v1772_v31, %v1760_v53  ;;  %v2588_v11 = vld [vmem:[#allocation7 + $0x18] sm:$0xff]   ;;  %v2589_v31 = vld [vmem:[#allocation7 + $0x20] sm:$0xff]  }
0x1908   :  { %2733 = vtanh.f32 %v1774_v10 }
0x1909   :  { %2735 = vtanh.f32 %v1775_v7 }
0x1912   :  { %v2734_v4 = vpop.eup %2733 }
0x1913   :  { %v2736_v8 = vpop.eup %2735  ;;  %1780 = vrot.lane.b32.xlu1 %v2734_v4, %s2842_s15  ;;  %v2591_v4 = vld [vmem:[#allocation7 + $0x30] sm:$0xff]  }
0x1914   :  { %1782 = vrot.lane.b32.xlu0 %v2736_v8, %s2842_s15  ;;  %v2592_v8 = vld [vmem:[#allocation7 + $0x38] sm:$0xff]  }
0x1985   :  { %v1781_v62 = vpop.permute.xlu1 %1780 }
0x1986   :  { %v1783_v49 = vpop.permute.xlu0 %1782 }
0x1987   :  { %v1784_v15 = vsel %vm594_vm2, %v1781_v62, %v1783_v49  ;;  %v2225_v62 = vld [vmem:[%s3789_s5] ss:$0 sm:$0xff] }
0x1988   :  { %v1786_v35 = vmul.f32 %v2726_v37, %v1784_v15 }
0x198a   :  { %v1790_v47 = vpack.c.bf16 %v1786_v35, %v1786_v35 }
0x198c   :  { %1792 = vrot.lane.b32.xlu1 %v1790_v47, %s2851_s3 }
0x19fe   :  { %v1793_v20 = vpop.permute.xlu1 %1792 }
0x19ff   :  { %2218 = vmatmul.mubr.msk.bf16.vlgmr.msra.gmra.mrb[56].mxu0 %vm476_vm4, %v1793_v20  ;;  %2508 = vmatmul.mubr.msk.bf16.vlgmr.msra.gmra.mrb[56].mxu1 %vm476_vm4, %v1793_v20 }
0x1a00   :  { %2515 = vmatprep.mubr.msk.bf16.mxu0 %vm2849_vm0, %v3803_v54  ;;  %2535 = vmatprep.mubr.msk.bf16.mxu1 %vm2849_vm0, %v3803_v54 }
0x1a01   :  { %2512 = vmatpush3.bf16.msra.mxu0 %v2583_v60  ;;  %2520 = vmatpush3.bf16.msra.mxu1 %v2585_v46 }
0x1a02   :  { %2513 = vmatprep.subr.bf16.mxu0 %v3803_v54  ;;  %2521 = vmatprep.subr.bf16.mxu1 %v3803_v54 }
0x1a05   :  { %2514 = vmatpush3.bf16.msra.mxu0 %v2584_v34  ;;  %2522 = vmatpush3.bf16.msra.mxu1 %v2586_v48 }
0x1a06   :  { %2523 = vmatprep.subr.bf16.mxu1 %v3803_v54 }
0x1a09   :  { %2524 = vmatpush3.bf16.msra.mxu1 %v2587_v45 }
0x1a0a   :  { %2525 = vmatprep.subr.bf16.mxu1 %v3803_v54 }
0x1a0d   :  { %2526 = vmatpush3.bf16.msra.mxu1 %v2588_v11 }
0x1a0e   :  { %2527 = vmatprep.subr.bf16.mxu1 %v3803_v54 }
0x1a11   :  { %2528 = vmatpush3.bf16.msra.mxu1 %v2589_v31 }
0x1a12   :  { %2529 = vmatprep.subr.bf16.mxu1 %v3803_v54 }
0x1ad2   :  { %v1831_v36 = vpop.f32.mrb[56].mxu0  ;;  %v1872_v6 = vpop.f32.mrb[56].mxu1 }
0x1ad3   :  { %v1878_v50 = vadd.f32 %v1831_v36, %v3806_v1  ;;  %v1880_v41 = vadd.f32 %v1872_v6, %v3807_v0  ;;  %v1833_v32 = vpop.f32.mrb[57].mxu0  ;;  %v2509_v25 = vpop.f32.mrb[57].mxu1  ;;  %v2229_v1 = vld [vmem:[%s3791_s7] ss:$0 sm:$0xff] }
0x1ad4   :  { %v1879_v24 = vadd.f32 %v1833_v32, %v3808_v2  ;;  %v1835_v9 = vpop.f32.mrb[58].mxu0  ;;  %v1875_v58 = vpop.f32.mrb[58].mxu1 }
0x1ad5   :  { %v2222_v44 = vmul.f32 -1.442695, %v1880_v41  ;;  %v1836_v38 = vpop.f32.mrb[59].mxu0  ;;  %v2510_v3 = vpop.f32.mrb[59].mxu1  ;;  %v2220_v19 = vmul.f32 -1.442695, %v1878_v50 }
0x1ad6   :  { %v2221_v33 = vmul.f32 -1.442695, %v1879_v24 }
0x1ad7   :  { %2737 = vpow2.f32 %v2222_v44 }
0x1ad8   :  { %2739 = vpow2.f32 %v2221_v33 }
0x1ae1   :  { %v2738_v42 = vpop.eup %2737 }
0x1ae2   :  { %v2740_v39 = vpop.eup %2739  ;;  %v1892_v52 = vadd.f32 1.0, %v2738_v42 }
0x1ae3   :  { %v1891_v61 = vadd.f32 1.0, %v2740_v39 }
0x1ae4   :  { %2741 = vrcp.f32 %v1892_v52 }
0x1ae5   :  { %2743 = vrcp.f32 %v1891_v61 }
0x1ae6   :  { %2745 = vpow2.f32 %v2220_v19 }
0x1aee   :  { %v2742_v51 = vpop.eup %2741 }
0x1aef   :  { %v2744_v12 = vpop.eup %2743  ;;  %v1900_v13 = vmul.f32 2.0, %v2742_v51 }
0x1af0   :  { %v1899_v14 = vmul.f32 2.0, %v2744_v12  ;;  %v2746_v21 = vpop.eup %2745  ;;  %v1904_v16 = vmul.f32 %v2744_v12, %v1775_v7 }
0x1af1   :  { %v2224_v17 = vadd.f32 -1.0, %v1900_v13  ;;  %v1890_v22 = vadd.f32 1.0, %v2746_v21 }
0x1af2   :  { %v2223_v18 = vadd.f32 -1.0, %v1899_v14 }
0x1af3   :  { %1909 = vrot.lane.b32.xlu1 %v2224_v17, %s2842_s15  ;;  %2747 = vrcp.f32 %v1890_v22 }
0x1af4   :  { %1907 = vrot.lane.b32.xlu0 %v2223_v18, %s2842_s15 }
0x1afd   :  { %v2748_v27 = vpop.eup %2747 }
0x1afe   :  { %v1903_v5 = vmul.f32 %v2748_v27, %v1774_v10  ;;  %v2590_v10 = vld [vmem:[#allocation7 + $0x28] sm:$0xff]  }
0x1aff   :  { %2530 = vmatpush3.bf16.msra.mxu1 %v2590_v10 }
0x1b00   :  { %2531 = vmatprep.subr.bf16.mxu1 %v3803_v54 }
0x1b03   :  { %2532 = vmatpush3.bf16.msra.mxu1 %v2591_v4 }
0x1b04   :  { %2533 = vmatprep.subr.bf16.mxu1 %v3803_v54 }
0x1b07   :  { %2534 = vmatpush3.bf16.msra.mxu1 %v2592_v8 }
0x1b65   :  { %v1910_v23 = vpop.permute.xlu1 %1909 }
0x1b66   :  { %v1908_v26 = vpop.permute.xlu0 %1907 }
0x1b67   :  { %v1911_v28 = vsel %vm594_vm2, %v1908_v26, %v1910_v23 }
0x1b68   :  { %v1913_v30 = vmul.f32 %v2748_v27, %v1911_v28 }
0x1b6a   :  { %1915 = vrot.lane.b32.xlu0 %v1913_v30, %s2851_s3 }
0x1bdc   :  { %v1916_v37 = vpop.permute.xlu0 %1915 }
0x1bdd   :  { %v1918_v29 = vadd.f32 %v1916_v37, %v1903_v5  ;;  %v1919_v56 = vadd.f32 %v1916_v37, %v1904_v16 }
0x1bdf   :  { %2749 = vtanh.f32 %v1918_v29 }
0x1be0   :  { %2751 = vtanh.f32 %v1919_v56 }
0x1be9   :  { %v2750_v43 = vpop.eup %2749 }
0x1bea   :  { %v2752_v40 = vpop.eup %2751  ;;  %1924 = vrot.lane.b32.xlu1 %v2750_v43, %s2842_s15 }
0x1beb   :  { %1926 = vrot.lane.b32.xlu0 %v2752_v40, %s2842_s15 }
0x1c5c   :  { %v1925_v55 = vpop.permute.xlu1 %1924 }
0x1c5d   :  { %v1927_v59 = vpop.permute.xlu0 %1926 }
0x1c5e   :  { %v1928_v63 = vsel %vm594_vm2, %v1925_v55, %v1927_v59 }
0x1c5f   :  { %v1930_v57 = vmul.f32 %v2742_v51, %v1928_v63 }
0x1c61   :  { %v1931_v53 = vpack.c.bf16 %v1930_v57, %v1930_v57 }
0x1c63   :  { %1944 = vrot.lane.b32.xlu1 %v1931_v53, %s2852_s28 }
0x1cd5   :  { %v1945_v7 = vpop.permute.xlu1 %1944 }
0x1cd6   :  { %2516 = vmatmul.mubr.msk.bf16.vlgmr.msra.gmra.mrb[60].mxu0 %vm143_vm1, %v1945_v7 }
0x1da9   :  { %v1995_v49 = vpop.f32.mrb[60].mxu0 }
0x1daa   :  { %v1996_v15 = vadd.f32 %v2225_v62, %v1995_v49  ;;  %v2517_v35 = vpop.f32.mrb[61].mxu0 }
0x1dab   :  { %v1998_v47 = vpop.f32.mrb[62].mxu0 }
0x1dac   :  { %v2001_v20 = vmax.f32 %v1996_v15, 0.0  ;;  %v2518_v36 = vpop.f32.mrb[63].mxu0 }
0x1dae   :  { %v2002_v6 = vpack.c.bf16 %v2001_v20, %v2001_v20 }
0x1db0   :  { %2536 = vmatmul.mubr.bf16.vlgmr.msra.gmra.mrb[60].mxu1 %v2002_v6 }
0x1e83   :  { %v2108_v50 = vpop.f32.mrb[60].mxu1 }
0x1e84   :  { %v2109_v54 = vadd.f32 %v2229_v1, %v2108_v50  ;;  %v2537_v0 = vpop.f32.mrb[61].mxu1 }
0x1e85   :  { %v2111_v41 = vpop.f32.mrb[62].mxu1 }
0x1e86   :  { %2114 = vst [vmem:[%s3792_s8] sm:$0xff] %v2109_v54  ;;  %v2538_v32 = vpop.f32.mrb[63].mxu1 }
0x1e87   :  { %2119 = vsyncpa [#allocation4], 1 }
0x1e88   :  { %2120 = vsyncpa [#allocation6], 1 }

</bundles_post_ra>
